<compile_context>
chip_gen: v7x
topology: tpu7x:2x2x1
jax: 0.10.0
libtpu: 0.0.40
codegen_flags: <defaults>
</compile_context>

<pallas_src>
import functools

import jax
import jax.numpy as jnp
import numpy as np
from jax.experimental import pallas as pl
from jax.experimental.pallas import tpu as pltpu


def _phi(v):
    # elu(v) + 1  (alpha = 1)
    return jnp.where(v > 0, v + 1.0, jnp.exp(v))


def _linear_attention_kernel(
    x_ref, lnw_ref, lnb_ref, wf_ref, bsc_ref,
    w1_ref, b1_ref, w2_ref, b2_ref,
    s0_ref, z0_ref,
    y_ref, s_ref, z_ref,
    s_scr, z_scr,
    *, full_state, mxu_dtype,
):
    tq = x_ref.shape[1]
    D = z0_ref.shape[-1]
    c = pl.program_id(1)

    # (re)load the recurrent state at the first time-chunk of each batch elem
    @pl.when(c == 0)
    def _():
        if full_state:
            s_scr[...] = s0_ref[0]          # [1, D*D] flat carry
        else:
            s_scr[...] = s0_ref[0, 0]       # [D, D] matrix carry
        z_scr[...] = z0_ref[0]

    cast = lambda a: a.astype(mxu_dtype)

    # --- LayerNorm (biased variance, eps=1e-5, affine) ---
    x = x_ref[0]                                             # [tq, F]
    mean = jnp.mean(x, axis=-1, keepdims=True)
    var = jnp.mean((x - mean) ** 2, axis=-1, keepdims=True)
    xn = (x - mean) * jax.lax.rsqrt(var + 1e-5) * lnw_ref[...] + lnb_ref[...]

    # --- fused K/Q/V/shortcut projection: one lane-dense [tq, 4D] matmul ---
    proj = jnp.dot(xn, wf_ref[...], preferred_element_type=jnp.float32)
    K = _phi(proj[:, :D])
    Q = _phi(proj[:, D:2 * D])
    V = proj[:, 2 * D:3 * D]
    shortcut = proj[:, 3 * D:] + bsc_ref[...]

    # --- causal lower-triangular mask, built in-register ---
    row = jax.lax.broadcasted_iota(jnp.int32, (tq, tq), 0)
    col = jax.lax.broadcasted_iota(jnp.int32, (tq, tq), 1)
    tril = (row >= col).astype(jnp.float32)

    # --- Z trajectory (kept in f32: it is only [tq, D]) ---
    Z = z_scr[...] + jnp.dot(tril, K, preferred_element_type=jnp.float32)
    den = jnp.sum(Q * Z, axis=-1, keepdims=True) + 1e-5

    if full_state:
        # S trajectory, one D-wide column block at a time:
        #   S[:, i*D:(i+1)*D] = S_carry[i, :] + tril @ (K[:, i] * V)
        # num is accumulated from the very same blocks, so y is exactly
        # consistent with the emitted state (single carry, no expand matmul).
        tril_c = cast(tril)
        num = jnp.zeros((tq, D), jnp.float32)
        blocks = []
        for i in range(D):
            kiv = cast(K[:, i:i + 1] * V)                    # [tq, D]
            s_i = s_scr[:, i * D:(i + 1) * D] + jnp.dot(
                tril_c, kiv, preferred_element_type=jnp.float32)
            num += Q[:, i:i + 1] * s_i
            blocks.append(s_i)
        slab = jnp.concatenate(blocks, axis=1)               # [tq, D*D] f32
        s_ref[0] = slab.astype(s_ref.dtype)                  # one lane-dense store
        s_scr[...] = slab[tq - 1:tq, :]                      # flat carry
        z_ref[0] = Z.astype(z_ref.dtype)
    else:
        # Standard chunked linear attention; only the final state is emitted
        # (no [B, T, D*D] HBM stream at all).
        Kc, Qc, Vc = cast(K), cast(Q), cast(V)
        A = jax.lax.dot_general(Qc, Kc, (((1,), (1,)), ((), ())),
                                preferred_element_type=jnp.float32) * tril
        num = (jnp.dot(Qc, cast(s_scr[...]), preferred_element_type=jnp.float32)
               + jnp.dot(cast(A), Vc, preferred_element_type=jnp.float32))
        s_new = s_scr[...] + jax.lax.dot_general(
            Kc, Vc, (((0,), (0,)), ((), ())),
            preferred_element_type=jnp.float32)
        s_scr[...] = s_new
        s_ref[0, 0] = s_new.astype(s_ref.dtype)   # block resident across chunks
        z_ref[0] = Z[tq - 1:tq, :].astype(z_ref.dtype)

    z_scr[...] = Z[tq - 1:tq, :]

    # --- output head: reciprocal on the EUP, MLP, residual shortcut ---
    out = num * pl.reciprocal(den, approx=False)
    h = jnp.maximum(
        jnp.dot(out, w1_ref[...], preferred_element_type=jnp.float32)
        + b1_ref[...], 0.0)
    h = jnp.maximum(
        jnp.dot(h, w2_ref[...], preferred_element_type=jnp.float32)
        + b2_ref[...], 0.0)
    y_ref[0] = h + shortcut


def linear_attention_block(x, state, params, *, chunk=128,
                           mxu_dtype=jnp.bfloat16, full_state=True,
                           state_dtype=jnp.float32):
    """x: [B,T,F]; state = (S0 [B,1,D,D], Z0 [B,1,D]).

    Returns (y [B,T,D], [S, Z]).  full_state=True matches the PyTorch forward
    exactly (S:[B,T,D,D], Z:[B,T,D]); full_state=False returns only the final
    state (S:[B,1,D,D], Z:[B,1,D]) and skips the big trajectory writeback.
    """
    S0, Z0 = state
    B, T, F = x.shape
    D = params["Wk"].shape[1]

    # NOTE(v7x): with D=128 and the trajectory output, prefer chunk<=64 so the
    # f32 slab + double-buffered S output block fit the 64 MiB VMEM.
    tq = min(chunk, T)
    assert T % tq == 0, "T must be a multiple of the time-chunk size"
    assert tq == T or tq % 8 == 0, "time-chunk must be a multiple of 8"
    C = T // tq

    # fused projection weight [F, 4D]: K | Q | V | shortcut
    wf = jnp.concatenate(
        [params["Wk"], params["Wq"], params["Wv"], params["Wsc"]], axis=1)

    def const(shape):
        return pl.BlockSpec(shape, lambda b, c: (0,) * len(shape))

    if full_state:
        s0_in = S0.reshape(B, 1, D * D)
        s0_spec = pl.BlockSpec((1, 1, D * D), lambda b, c: (b, 0, 0))
        s_out_shape = jax.ShapeDtypeStruct((B, T, D * D), state_dtype)
        s_out_spec = pl.BlockSpec((1, tq, D * D), lambda b, c: (b, c, 0))
        z_out_shape = jax.ShapeDtypeStruct((B, T, D), state_dtype)
        z_out_spec = pl.BlockSpec((1, tq, D), lambda b, c: (b, c, 0))
        s_scratch = pltpu.VMEM((1, D * D), jnp.float32)
    else:
        s0_in = S0
        s0_spec = pl.BlockSpec((1, 1, D, D), lambda b, c: (b, 0, 0, 0))
        s_out_shape = jax.ShapeDtypeStruct((B, 1, D, D), state_dtype)
        s_out_spec = pl.BlockSpec((1, 1, D, D), lambda b, c: (b, 0, 0, 0))
        z_out_shape = jax.ShapeDtypeStruct((B, 1, D), state_dtype)
        z_out_spec = pl.BlockSpec((1, 1, D), lambda b, c: (b, 0, 0))
        s_scratch = pltpu.VMEM((D, D), jnp.float32)

    kernel = functools.partial(_linear_attention_kernel,
                               full_state=full_state, mxu_dtype=mxu_dtype)

    y, s_out, z_out = pl.pallas_call(
        kernel,
        out_shape=(jax.ShapeDtypeStruct((B, T, D), jnp.float32),
                   s_out_shape, z_out_shape),
        grid=(B, C),
        in_specs=[
            pl.BlockSpec((1, tq, F), lambda b, c: (b, c, 0)),   # x
            const((1, F)), const((1, F)),                       # LN w, b
            const((F, 4 * D)), const((1, D)),                   # fused W, bsc
            const((D, D)), const((1, D)),                       # W1, b1
            const((D, D)), const((1, D)),                       # W2, b2
            s0_spec,                                            # S0
            pl.BlockSpec((1, 1, D), lambda b, c: (b, 0, 0)),    # Z0
        ],
        out_specs=(pl.BlockSpec((1, tq, D), lambda b, c: (b, c, 0)),
                   s_out_spec, z_out_spec),
        scratch_shapes=[s_scratch, pltpu.VMEM((1, D), jnp.float32)],
        compiler_params=pltpu.CompilerParams(
            dimension_semantics=("parallel", "arbitrary"),
            vmem_limit_bytes=32 * 1024 * 1024),
    )(x, params["lnw"], params["lnb"], wf, params["bsc"],
      params["W1"], params["b1"], params["W2"], params["b2"],
      s0_in, Z0)

    if full_state:
        return y, [s_out.reshape(B, T, D, D), z_out]
    return y, [s_out, z_out]


def reference(x, state, p):
    """Plain-JAX replica of the PyTorch forward (for verification)."""
    S0, Z0 = state
    mean = x.mean(-1, keepdims=True)
    var = ((x - mean) ** 2).mean(-1, keepdims=True)
    xn = (x - mean) / jnp.sqrt(var + 1e-5) * p["lnw"][0] + p["lnb"][0]
    K = _phi(xn @ p["Wk"])
    Q = _phi(xn @ p["Wq"])
    V = xn @ p["Wv"]
    outer = jnp.einsum("bti,btj->btij", K, V)
    S = jnp.cumsum(outer, axis=1) + S0                      # [B,T,D,D]
    Z = jnp.cumsum(K, axis=1) + Z0                          # [B,T,D]
    num = jnp.einsum("bti,btil->btl", Q, S)
    den = jnp.einsum("bti,bti->bt", Q, Z)[..., None] + 1e-5
    out = num / den
    out = jnp.maximum(out @ p["W1"] + p["b1"][0], 0.0)
    out = jnp.maximum(out @ p["W2"] + p["b2"][0], 0.0)
    out = out + xn @ p["Wsc"] + p["bsc"][0]
    return out, [S, Z]


def make_params(key, input_size, hidden_size):
    ks = jax.random.split(key, 9)
    s = 0.1
    f32 = jnp.float32
    return {
        "lnw": jnp.ones((1, input_size), f32),
        "lnb": jnp.zeros((1, input_size), f32),
        "Wk": s * jax.random.normal(ks[0], (input_size, hidden_size), f32),
        "Wq": s * jax.random.normal(ks[1], (input_size, hidden_size), f32),
        "Wv": s * jax.random.normal(ks[2], (input_size, hidden_size), f32),
        "W1": s * jax.random.normal(ks[3], (hidden_size, hidden_size), f32),
        "b1": s * jax.random.normal(ks[4], (1, hidden_size), f32),
        "W2": s * jax.random.normal(ks[5], (hidden_size, hidden_size), f32),
        "b2": s * jax.random.normal(ks[6], (1, hidden_size), f32),
        "Wsc": s * jax.random.normal(ks[7], (input_size, hidden_size), f32),
        "bsc": s * jax.random.normal(ks[8], (1, hidden_size), f32),
    }


def _check(a, b, tol):
    np.testing.assert_allclose(
        np.asarray(jnp.asarray(a, jnp.float32)),
        np.asarray(jnp.asarray(b, jnp.float32)),
        rtol=tol, atol=tol)


if __name__ == "__main__":
    B, T, F_IN, D = 2, 16, 16, 32

    key = jax.random.PRNGKey(0)
    k_x, k_p, k_s, k_z = jax.random.split(key, 4)
    x = jax.random.normal(k_x, (B, T, F_IN), jnp.float32)
    params = make_params(k_p, F_IN, D)

    # non-trivial initial recurrent state
    S0 = 0.1 * jax.random.normal(k_s, (B, 1, D, D), jnp.float32)
    Z0 = 0.1 * jax.random.normal(k_z, (B, 1, D), jnp.float32)

    y_ref, (S_ref, Z_ref) = reference(x, (S0, Z0), params)

    # 1) exact f32 path, two chunks, full trajectory state (module semantics)
    run_f32 = jax.jit(functools.partial(
        linear_attention_block, chunk=8, mxu_dtype=jnp.float32,
        full_state=True, state_dtype=jnp.float32))
    y, (S, Z) = jax.block_until_ready(run_f32(x, (S0, Z0), params))
    _check(y, y_ref, 1e-3)
    _check(S, S_ref, 1e-3)
    _check(Z, Z_ref, 1e-3)

    # 2) bf16 MXU operands + bf16-stored trajectory (fast full-state path)
    run_bf16 = jax.jit(functools.partial(
        linear_attention_block, chunk=8, mxu_dtype=jnp.bfloat16,
        full_state=True, state_dtype=jnp.bfloat16))
    y16, (S16, Z16) = jax.block_until_ready(run_bf16(x, (S0, Z0), params))
    _check(y16, y_ref, 3e-2)
    _check(S16, S_ref, 5e-2)   # bf16 storage + bf16 operand rounding
    _check(Z16, Z_ref, 3e-2)

    # 3) final-state-only path (no [B,T,D*D] HBM stream), exact f32, 2 chunks
    run_last = jax.jit(functools.partial(
        linear_attention_block, chunk=8, mxu_dtype=jnp.float32,
        full_state=False, state_dtype=jnp.float32))
    y3, (S3, Z3) = jax.block_until_ready(run_last(x, (S0, Z0), params))
    _check(y3, y_ref, 1e-3)
    _check(S3, S_ref[:, T - 1:T], 1e-3)
    _check(Z3, Z_ref[:, T - 1:T], 1e-3)

    # 4) final-state-only, bf16 MXU, single chunk
    run_last16 = jax.jit(functools.partial(
        linear_attention_block, chunk=16, mxu_dtype=jnp.bfloat16,
        full_state=False, state_dtype=jnp.float32))
    y4, (S4, Z4) = jax.block_until_ready(run_last16(x, (S0, Z0), params))
    _check(y4, y_ref, 3e-2)
    _check(S4, S_ref[:, T - 1:T], 3e-2)
    _check(Z4, Z_ref[:, T - 1:T], 3e-2)

    print("KERNEL_OK")
</pallas_src>

<mosaic_0001>
module attributes {stable_mosaic.version = 11 : i64} {
  func.func @_linear_attention_kernel(%arg0: i32, %arg1: i32, %arg2: memref<1x8x16xf32, #tpu.memory_space<vmem>>, %arg3: memref<1x16xf32, #tpu.memory_space<vmem>>, %arg4: memref<1x16xf32, #tpu.memory_space<vmem>>, %arg5: memref<16x128xf32, #tpu.memory_space<vmem>>, %arg6: memref<1x32xf32, #tpu.memory_space<vmem>>, %arg7: memref<32x32xf32, #tpu.memory_space<vmem>>, %arg8: memref<1x32xf32, #tpu.memory_space<vmem>>, %arg9: memref<32x32xf32, #tpu.memory_space<vmem>>, %arg10: memref<1x32xf32, #tpu.memory_space<vmem>>, %arg11: memref<1x1x1024xf32, #tpu.memory_space<vmem>>, %arg12: memref<1x1x32xf32, #tpu.memory_space<vmem>>, %arg13: memref<1x8x32xf32, #tpu.memory_space<vmem>>, %arg14: memref<1x8x1024xf32, #tpu.memory_space<vmem>>, %arg15: memref<1x8x32xf32, #tpu.memory_space<vmem>>, %arg16: memref<1x1024xf32, #tpu.memory_space<vmem>>, %arg17: memref<1x32xf32, #tpu.memory_space<vmem>>) attributes {dimension_semantics = [#tpu.dimension_semantics<parallel>, #tpu.dimension_semantics<arbitrary>], iteration_bounds = array<i64: 2, 2>, scalar_prefetch = 0 : i64, scratch_operands = 2 : i64, tpu.core_type = #tpu.core_type<tc>, window_params = [{transform_indices = @transform_0, window_bounds = array<i64: 1, 8, 16>}, {pipeline_mode = #tpu.pipeline_mode<synchronous>, transform_indices = @transform_1, window_bounds = array<i64: 1, 16>}, {pipeline_mode = #tpu.pipeline_mode<synchronous>, transform_indices = @transform_2, window_bounds = array<i64: 1, 16>}, {pipeline_mode = #tpu.pipeline_mode<synchronous>, transform_indices = @transform_3, window_bounds = array<i64: 16, 128>}, {pipeline_mode = #tpu.pipeline_mode<synchronous>, transform_indices = @transform_4, window_bounds = array<i64: 1, 32>}, {pipeline_mode = #tpu.pipeline_mode<synchronous>, transform_indices = @transform_5, window_bounds = array<i64: 32, 32>}, {pipeline_mode = #tpu.pipeline_mode<synchronous>, transform_indices = @transform_6, window_bounds = array<i64: 1, 32>}, {pipeline_mode = #tpu.pipeline_mode<synchronous>, transform_indices = @transform_7, window_bounds = array<i64: 32, 32>}, {pipeline_mode = #tpu.pipeline_mode<synchronous>, transform_indices = @transform_8, window_bounds = array<i64: 1, 32>}, {transform_indices = @transform_9, window_bounds = array<i64: 1, 1, 1024>}, {transform_indices = @transform_10, window_bounds = array<i64: 1, 1, 32>}, {transform_indices = @transform_11, window_bounds = array<i64: 1, 8, 32>}, {transform_indices = @transform_12, window_bounds = array<i64: 1, 8, 1024>}, {transform_indices = @transform_13, window_bounds = array<i64: 1, 8, 32>}]} {
    %c0_i32 = arith.constant 0 : i32
    %0 = arith.cmpi eq, %arg1, %c0_i32 : i32
    %1 = arith.extui %0 : i1 to i32
    %c0_i32_0 = arith.constant 0 : i32
    %2 = arith.cmpi ne, %1, %c0_i32_0 : i32
    scf.if %2 {
      %c0_116 = arith.constant 0 : index
      %c0_117 = arith.constant 0 : index
      %c0_118 = arith.constant 0 : index
      %451 = vector.load %arg11[%c0_116, %c0_117, %c0_118] : memref<1x1x1024xf32, #tpu.memory_space<vmem>>, vector<1x1x1024xf32>
      %452 = vector.shape_cast %451 : vector<1x1x1024xf32> to vector<1x1024xf32>
      %c0_119 = arith.constant 0 : index
      %c0_120 = arith.constant 0 : index
      %453 = vector.load %arg16[%c0_119, %c0_120] : memref<1x1024xf32, #tpu.memory_space<vmem>>, vector<1x1024xf32>
      tpu.vector_store %arg16[%c0_119, %c0_120], %452 {strides = array<i32>} : memref<1x1024xf32, #tpu.memory_space<vmem>>, vector<1x1024xf32>,
      %c0_121 = arith.constant 0 : index
      %c0_122 = arith.constant 0 : index
      %c0_123 = arith.constant 0 : index
      %454 = vector.load %arg12[%c0_121, %c0_122, %c0_123] : memref<1x1x32xf32, #tpu.memory_space<vmem>>, vector<1x1x32xf32>
      %455 = vector.shape_cast %454 : vector<1x1x32xf32> to vector<1x32xf32>
      %c0_124 = arith.constant 0 : index
      %c0_125 = arith.constant 0 : index
      %456 = vector.load %arg17[%c0_124, %c0_125] : memref<1x32xf32, #tpu.memory_space<vmem>>, vector<1x32xf32>
      tpu.vector_store %arg17[%c0_124, %c0_125], %455 {strides = array<i32>} : memref<1x32xf32, #tpu.memory_space<vmem>>, vector<1x32xf32>,
    } else {
    }
    %c0 = arith.constant 0 : index
    %c0_1 = arith.constant 0 : index
    %c0_2 = arith.constant 0 : index
    %3 = vector.load %arg2[%c0, %c0_1, %c0_2] : memref<1x8x16xf32, #tpu.memory_space<vmem>>, vector<1x8x16xf32>
    %4 = vector.shape_cast %3 : vector<1x8x16xf32> to vector<8x16xf32>
    %cst = arith.constant dense<0.000000e+00> : vector<8xf32>
    %5 = vector.multi_reduction <add>, %4, %cst [1] : vector<8x16xf32> to vector<8xf32>
    %6 = vector.shape_cast %5 : vector<8xf32> to vector<8x1xf32>
    %cst_3 = arith.constant 1.600000e+01 : f32
    %7 = vector.broadcast %cst_3 : f32 to vector<8x1xf32>
    %8 = arith.divf %6, %7 : vector<8x1xf32>
    %9 = vector.broadcast %8 : vector<8x1xf32> to vector<8x16xf32>
    %10 = arith.subf %4, %9 : vector<8x16xf32>
    %11 = arith.mulf %10, %10 : vector<8x16xf32>
    %cst_4 = arith.constant dense<0.000000e+00> : vector<8xf32>
    %12 = vector.multi_reduction <add>, %11, %cst_4 [1] : vector<8x16xf32> to vector<8xf32>
    %13 = vector.shape_cast %12 : vector<8xf32> to vector<8x1xf32>
    %cst_5 = arith.constant 1.600000e+01 : f32
    %14 = vector.broadcast %cst_5 : f32 to vector<8x1xf32>
    %15 = arith.divf %13, %14 : vector<8x1xf32>
    %16 = vector.broadcast %8 : vector<8x1xf32> to vector<8x16xf32>
    %17 = arith.subf %4, %16 : vector<8x16xf32>
    %cst_6 = arith.constant 9.99999974E-6 : f32
    %18 = vector.broadcast %cst_6 : f32 to vector<8x1xf32>
    %19 = arith.addf %15, %18 : vector<8x1xf32>
    %20 = math.rsqrt %19 : vector<8x1xf32>
    %21 = vector.broadcast %20 : vector<8x1xf32> to vector<8x16xf32>
    %22 = arith.mulf %17, %21 : vector<8x16xf32>
    %c0_7 = arith.constant 0 : index
    %c0_8 = arith.constant 0 : index
    %23 = vector.load %arg3[%c0_7, %c0_8] : memref<1x16xf32, #tpu.memory_space<vmem>>, vector<1x16xf32>
    %24 = vector.broadcast %23 : vector<1x16xf32> to vector<8x16xf32>
    %25 = arith.mulf %22, %24 : vector<8x16xf32>
    %c0_9 = arith.constant 0 : index
    %c0_10 = arith.constant 0 : index
    %26 = vector.load %arg4[%c0_9, %c0_10] : memref<1x16xf32, #tpu.memory_space<vmem>>, vector<1x16xf32>
    %27 = vector.broadcast %26 : vector<1x16xf32> to vector<8x16xf32>
    %28 = arith.addf %25, %27 : vector<8x16xf32>
    %c0_11 = arith.constant 0 : index
    %c0_12 = arith.constant 0 : index
    %29 = vector.load %arg5[%c0_11, %c0_12] : memref<16x128xf32, #tpu.memory_space<vmem>>, vector<16x128xf32>
    %cst_13 = arith.constant dense<0.000000e+00> : vector<8x128xf32>
    %30 = tpu.matmul %28, %29, %cst_13 {dimension_numbers = #tpu.dot_dimension_numbers<[1], [0], [0], [1], [0, 0, 1, 1], [], []>} : vector<8x16xf32>, vector<16x128xf32>, vector<8x128xf32> -> vector<8x128xf32>
    %31 = vector.extract_strided_slice %30 {offsets = [0, 0], sizes = [8, 32], strides = [1, 1]} : vector<8x128xf32> to vector<8x32xf32>
    %cst_14 = arith.constant 0.000000e+00 : f32
    %32 = vector.broadcast %cst_14 : f32 to vector<8x32xf32>
    %33 = arith.cmpf ogt, %31, %32 : vector<8x32xf32>
    %cst_15 = arith.constant 1.000000e+00 : f32
    %34 = vector.broadcast %cst_15 : f32 to vector<8x32xf32>
    %35 = arith.addf %31, %34 : vector<8x32xf32>
    %36 = math.exp %31 : vector<8x32xf32>
    %37 = arith.select %33, %35, %36 : vector<8x32xi1>, vector<8x32xf32>
    %38 = vector.extract_strided_slice %30 {offsets = [0, 32], sizes = [8, 32], strides = [1, 1]} : vector<8x128xf32> to vector<8x32xf32>
    %cst_16 = arith.constant 0.000000e+00 : f32
    %39 = vector.broadcast %cst_16 : f32 to vector<8x32xf32>
    %40 = arith.cmpf ogt, %38, %39 : vector<8x32xf32>
    %cst_17 = arith.constant 1.000000e+00 : f32
    %41 = vector.broadcast %cst_17 : f32 to vector<8x32xf32>
    %42 = arith.addf %38, %41 : vector<8x32xf32>
    %43 = math.exp %38 : vector<8x32xf32>
    %44 = arith.select %40, %42, %43 : vector<8x32xi1>, vector<8x32xf32>
    %45 = vector.extract_strided_slice %30 {offsets = [0, 64], sizes = [8, 32], strides = [1, 1]} : vector<8x128xf32> to vector<8x32xf32>
    %46 = vector.extract_strided_slice %30 {offsets = [0, 96], sizes = [8, 32], strides = [1, 1]} : vector<8x128xf32> to vector<8x32xf32>
    %c0_18 = arith.constant 0 : index
    %c0_19 = arith.constant 0 : index
    %47 = vector.load %arg6[%c0_18, %c0_19] : memref<1x32xf32, #tpu.memory_space<vmem>>, vector<1x32xf32>
    %48 = vector.broadcast %47 : vector<1x32xf32> to vector<8x32xf32>
    %49 = arith.addf %46, %48 : vector<8x32xf32>
    %50 = tpu.iota {dimensions = array<i32: 0>} : vector<8x8xi32>
    %51 = tpu.iota {dimensions = array<i32: 1>} : vector<8x8xi32>
    %52 = arith.cmpi sge, %50, %51 : vector<8x8xi32>
    %53 = arith.extui %52 : vector<8x8xi1> to vector<8x8xi32>
    %54 = arith.sitofp %53 : vector<8x8xi32> to vector<8x8xf32>
    %c0_20 = arith.constant 0 : index
    %c0_21 = arith.constant 0 : index
    %55 = vector.load %arg17[%c0_20, %c0_21] : memref<1x32xf32, #tpu.memory_space<vmem>>, vector<1x32xf32>
    %cst_22 = arith.constant dense<0.000000e+00> : vector<8x32xf32>
    %56 = tpu.matmul %54, %37, %cst_22 {dimension_numbers = #tpu.dot_dimension_numbers<[1], [0], [0], [1], [0, 0, 1, 1], [], []>} : vector<8x8xf32>, vector<8x32xf32>, vector<8x32xf32> -> vector<8x32xf32>
    %57 = vector.broadcast %55 : vector<1x32xf32> to vector<8x32xf32>
    %58 = arith.addf %57, %56 : vector<8x32xf32>
    %59 = arith.mulf %44, %58 : vector<8x32xf32>
    %cst_23 = arith.constant dense<0.000000e+00> : vector<8xf32>
    %60 = vector.multi_reduction <add>, %59, %cst_23 [1] : vector<8x32xf32> to vector<8xf32>
    %61 = vector.shape_cast %60 : vector<8xf32> to vector<8x1xf32>
    %cst_24 = arith.constant 9.99999974E-6 : f32
    %62 = vector.broadcast %cst_24 : f32 to vector<8x1xf32>
    %63 = arith.addf %61, %62 : vector<8x1xf32>
    %cst_25 = arith.constant 0.000000e+00 : f32
    %64 = vector.broadcast %cst_25 : f32 to vector<8x32xf32>
    %65 = vector.extract_strided_slice %37 {offsets = [0, 0], sizes = [8, 1], strides = [1, 1]} : vector<8x32xf32> to vector<8x1xf32>
    %66 = vector.broadcast %65 : vector<8x1xf32> to vector<8x32xf32>
    %67 = arith.mulf %66, %45 : vector<8x32xf32>
    %c0_26 = arith.constant 0 : index
    %c0_27 = arith.constant 0 : index
    %68 = vector.load %arg16[%c0_26, %c0_27] : memref<1x1024xf32, #tpu.memory_space<vmem>>, vector<1x32xf32>
    %cst_28 = arith.constant dense<0.000000e+00> : vector<8x32xf32>
    %69 = tpu.matmul %54, %67, %cst_28 {dimension_numbers = #tpu.dot_dimension_numbers<[1], [0], [0], [1], [0, 0, 1, 1], [], []>} : vector<8x8xf32>, vector<8x32xf32>, vector<8x32xf32> -> vector<8x32xf32>
    %70 = vector.broadcast %68 : vector<1x32xf32> to vector<8x32xf32>
    %71 = arith.addf %70, %69 : vector<8x32xf32>
    %72 = vector.extract_strided_slice %44 {offsets = [0, 0], sizes = [8, 1], strides = [1, 1]} : vector<8x32xf32> to vector<8x1xf32>
    %73 = vector.broadcast %72 : vector<8x1xf32> to vector<8x32xf32>
    %74 = arith.mulf %73, %71 : vector<8x32xf32>
    %75 = arith.addf %64, %74 : vector<8x32xf32>
    %76 = vector.extract_strided_slice %37 {offsets = [0, 1], sizes = [8, 1], strides = [1, 1]} : vector<8x32xf32> to vector<8x1xf32>
    %77 = vector.broadcast %76 : vector<8x1xf32> to vector<8x32xf32>
    %78 = arith.mulf %77, %45 : vector<8x32xf32>
    %c0_29 = arith.constant 0 : index
    %c32 = arith.constant 32 : index
    %79 = vector.load %arg16[%c0_29, %c32] : memref<1x1024xf32, #tpu.memory_space<vmem>>, vector<1x32xf32>
    %cst_30 = arith.constant dense<0.000000e+00> : vector<8x32xf32>
    %80 = tpu.matmul %54, %78, %cst_30 {dimension_numbers = #tpu.dot_dimension_numbers<[1], [0], [0], [1], [0, 0, 1, 1], [], []>} : vector<8x8xf32>, vector<8x32xf32>, vector<8x32xf32> -> vector<8x32xf32>
    %81 = vector.broadcast %79 : vector<1x32xf32> to vector<8x32xf32>
    %82 = arith.addf %81, %80 : vector<8x32xf32>
    %83 = vector.extract_strided_slice %44 {offsets = [0, 1], sizes = [8, 1], strides = [1, 1]} : vector<8x32xf32> to vector<8x1xf32>
    %84 = vector.broadcast %83 : vector<8x1xf32> to vector<8x32xf32>
    %85 = arith.mulf %84, %82 : vector<8x32xf32>
    %86 = arith.addf %75, %85 : vector<8x32xf32>
    %87 = vector.extract_strided_slice %37 {offsets = [0, 2], sizes = [8, 1], strides = [1, 1]} : vector<8x32xf32> to vector<8x1xf32>
    %88 = vector.broadcast %87 : vector<8x1xf32> to vector<8x32xf32>
    %89 = arith.mulf %88, %45 : vector<8x32xf32>
    %c0_31 = arith.constant 0 : index
    %c64 = arith.constant 64 : index
    %90 = vector.load %arg16[%c0_31, %c64] : memref<1x1024xf32, #tpu.memory_space<vmem>>, vector<1x32xf32>
    %cst_32 = arith.constant dense<0.000000e+00> : vector<8x32xf32>
    %91 = tpu.matmul %54, %89, %cst_32 {dimension_numbers = #tpu.dot_dimension_numbers<[1], [0], [0], [1], [0, 0, 1, 1], [], []>} : vector<8x8xf32>, vector<8x32xf32>, vector<8x32xf32> -> vector<8x32xf32>
    %92 = vector.broadcast %90 : vector<1x32xf32> to vector<8x32xf32>
    %93 = arith.addf %92, %91 : vector<8x32xf32>
    %94 = vector.extract_strided_slice %44 {offsets = [0, 2], sizes = [8, 1], strides = [1, 1]} : vector<8x32xf32> to vector<8x1xf32>
    %95 = vector.broadcast %94 : vector<8x1xf32> to vector<8x32xf32>
    %96 = arith.mulf %95, %93 : vector<8x32xf32>
    %97 = arith.addf %86, %96 : vector<8x32xf32>
    %98 = vector.extract_strided_slice %37 {offsets = [0, 3], sizes = [8, 1], strides = [1, 1]} : vector<8x32xf32> to vector<8x1xf32>
    %99 = vector.broadcast %98 : vector<8x1xf32> to vector<8x32xf32>
    %100 = arith.mulf %99, %45 : vector<8x32xf32>
    %c0_33 = arith.constant 0 : index
    %c96 = arith.constant 96 : index
    %101 = vector.load %arg16[%c0_33, %c96] : memref<1x1024xf32, #tpu.memory_space<vmem>>, vector<1x32xf32>
    %cst_34 = arith.constant dense<0.000000e+00> : vector<8x32xf32>
    %102 = tpu.matmul %54, %100, %cst_34 {dimension_numbers = #tpu.dot_dimension_numbers<[1], [0], [0], [1], [0, 0, 1, 1], [], []>} : vector<8x8xf32>, vector<8x32xf32>, vector<8x32xf32> -> vector<8x32xf32>
    %103 = vector.broadcast %101 : vector<1x32xf32> to vector<8x32xf32>
    %104 = arith.addf %103, %102 : vector<8x32xf32>
    %105 = vector.extract_strided_slice %44 {offsets = [0, 3], sizes = [8, 1], strides = [1, 1]} : vector<8x32xf32> to vector<8x1xf32>
    %106 = vector.broadcast %105 : vector<8x1xf32> to vector<8x32xf32>
    %107 = arith.mulf %106, %104 : vector<8x32xf32>
    %108 = arith.addf %97, %107 : vector<8x32xf32>
    %109 = vector.extract_strided_slice %37 {offsets = [0, 4], sizes = [8, 1], strides = [1, 1]} : vector<8x32xf32> to vector<8x1xf32>
    %110 = vector.broadcast %109 : vector<8x1xf32> to vector<8x32xf32>
    %111 = arith.mulf %110, %45 : vector<8x32xf32>
    %c0_35 = arith.constant 0 : index
    %c128 = arith.constant 128 : index
    %112 = vector.load %arg16[%c0_35, %c128] : memref<1x1024xf32, #tpu.memory_space<vmem>>, vector<1x32xf32>
    %cst_36 = arith.constant dense<0.000000e+00> : vector<8x32xf32>
    %113 = tpu.matmul %54, %111, %cst_36 {dimension_numbers = #tpu.dot_dimension_numbers<[1], [0], [0], [1], [0, 0, 1, 1], [], []>} : vector<8x8xf32>, vector<8x32xf32>, vector<8x32xf32> -> vector<8x32xf32>
    %114 = vector.broadcast %112 : vector<1x32xf32> to vector<8x32xf32>
    %115 = arith.addf %114, %113 : vector<8x32xf32>
    %116 = vector.extract_strided_slice %44 {offsets = [0, 4], sizes = [8, 1], strides = [1, 1]} : vector<8x32xf32> to vector<8x1xf32>
    %117 = vector.broadcast %116 : vector<8x1xf32> to vector<8x32xf32>
    %118 = arith.mulf %117, %115 : vector<8x32xf32>
    %119 = arith.addf %108, %118 : vector<8x32xf32>
    %120 = vector.extract_strided_slice %37 {offsets = [0, 5], sizes = [8, 1], strides = [1, 1]} : vector<8x32xf32> to vector<8x1xf32>
    %121 = vector.broadcast %120 : vector<8x1xf32> to vector<8x32xf32>
    %122 = arith.mulf %121, %45 : vector<8x32xf32>
    %c0_37 = arith.constant 0 : index
    %c160 = arith.constant 160 : index
    %123 = vector.load %arg16[%c0_37, %c160] : memref<1x1024xf32, #tpu.memory_space<vmem>>, vector<1x32xf32>
    %cst_38 = arith.constant dense<0.000000e+00> : vector<8x32xf32>
    %124 = tpu.matmul %54, %122, %cst_38 {dimension_numbers = #tpu.dot_dimension_numbers<[1], [0], [0], [1], [0, 0, 1, 1], [], []>} : vector<8x8xf32>, vector<8x32xf32>, vector<8x32xf32> -> vector<8x32xf32>
    %125 = vector.broadcast %123 : vector<1x32xf32> to vector<8x32xf32>
    %126 = arith.addf %125, %124 : vector<8x32xf32>
    %127 = vector.extract_strided_slice %44 {offsets = [0, 5], sizes = [8, 1], strides = [1, 1]} : vector<8x32xf32> to vector<8x1xf32>
    %128 = vector.broadcast %127 : vector<8x1xf32> to vector<8x32xf32>
    %129 = arith.mulf %128, %126 : vector<8x32xf32>
    %130 = arith.addf %119, %129 : vector<8x32xf32>
    %131 = vector.extract_strided_slice %37 {offsets = [0, 6], sizes = [8, 1], strides = [1, 1]} : vector<8x32xf32> to vector<8x1xf32>
    %132 = vector.broadcast %131 : vector<8x1xf32> to vector<8x32xf32>
    %133 = arith.mulf %132, %45 : vector<8x32xf32>
    %c0_39 = arith.constant 0 : index
    %c192 = arith.constant 192 : index
    %134 = vector.load %arg16[%c0_39, %c192] : memref<1x1024xf32, #tpu.memory_space<vmem>>, vector<1x32xf32>
    %cst_40 = arith.constant dense<0.000000e+00> : vector<8x32xf32>
    %135 = tpu.matmul %54, %133, %cst_40 {dimension_numbers = #tpu.dot_dimension_numbers<[1], [0], [0], [1], [0, 0, 1, 1], [], []>} : vector<8x8xf32>, vector<8x32xf32>, vector<8x32xf32> -> vector<8x32xf32>
    %136 = vector.broadcast %134 : vector<1x32xf32> to vector<8x32xf32>
    %137 = arith.addf %136, %135 : vector<8x32xf32>
    %138 = vector.extract_strided_slice %44 {offsets = [0, 6], sizes = [8, 1], strides = [1, 1]} : vector<8x32xf32> to vector<8x1xf32>
    %139 = vector.broadcast %138 : vector<8x1xf32> to vector<8x32xf32>
    %140 = arith.mulf %139, %137 : vector<8x32xf32>
    %141 = arith.addf %130, %140 : vector<8x32xf32>
    %142 = vector.extract_strided_slice %37 {offsets = [0, 7], sizes = [8, 1], strides = [1, 1]} : vector<8x32xf32> to vector<8x1xf32>
    %143 = vector.broadcast %142 : vector<8x1xf32> to vector<8x32xf32>
    %144 = arith.mulf %143, %45 : vector<8x32xf32>
    %c0_41 = arith.constant 0 : index
    %c224 = arith.constant 224 : index
    %145 = vector.load %arg16[%c0_41, %c224] : memref<1x1024xf32, #tpu.memory_space<vmem>>, vector<1x32xf32>
    %cst_42 = arith.constant dense<0.000000e+00> : vector<8x32xf32>
    %146 = tpu.matmul %54, %144, %cst_42 {dimension_numbers = #tpu.dot_dimension_numbers<[1], [0], [0], [1], [0, 0, 1, 1], [], []>} : vector<8x8xf32>, vector<8x32xf32>, vector<8x32xf32> -> vector<8x32xf32>
    %147 = vector.broadcast %145 : vector<1x32xf32> to vector<8x32xf32>
    %148 = arith.addf %147, %146 : vector<8x32xf32>
    %149 = vector.extract_strided_slice %44 {offsets = [0, 7], sizes = [8, 1], strides = [1, 1]} : vector<8x32xf32> to vector<8x1xf32>
    %150 = vector.broadcast %149 : vector<8x1xf32> to vector<8x32xf32>
    %151 = arith.mulf %150, %148 : vector<8x32xf32>
    %152 = arith.addf %141, %151 : vector<8x32xf32>
    %153 = vector.extract_strided_slice %37 {offsets = [0, 8], sizes = [8, 1], strides = [1, 1]} : vector<8x32xf32> to vector<8x1xf32>
    %154 = vector.broadcast %153 : vector<8x1xf32> to vector<8x32xf32>
    %155 = arith.mulf %154, %45 : vector<8x32xf32>
    %c0_43 = arith.constant 0 : index
    %c256 = arith.constant 256 : index
    %156 = vector.load %arg16[%c0_43, %c256] : memref<1x1024xf32, #tpu.memory_space<vmem>>, vector<1x32xf32>
    %cst_44 = arith.constant dense<0.000000e+00> : vector<8x32xf32>
    %157 = tpu.matmul %54, %155, %cst_44 {dimension_numbers = #tpu.dot_dimension_numbers<[1], [0], [0], [1], [0, 0, 1, 1], [], []>} : vector<8x8xf32>, vector<8x32xf32>, vector<8x32xf32> -> vector<8x32xf32>
    %158 = vector.broadcast %156 : vector<1x32xf32> to vector<8x32xf32>
    %159 = arith.addf %158, %157 : vector<8x32xf32>
    %160 = vector.extract_strided_slice %44 {offsets = [0, 8], sizes = [8, 1], strides = [1, 1]} : vector<8x32xf32> to vector<8x1xf32>
    %161 = vector.broadcast %160 : vector<8x1xf32> to vector<8x32xf32>
    %162 = arith.mulf %161, %159 : vector<8x32xf32>
    %163 = arith.addf %152, %162 : vector<8x32xf32>
    %164 = vector.extract_strided_slice %37 {offsets = [0, 9], sizes = [8, 1], strides = [1, 1]} : vector<8x32xf32> to vector<8x1xf32>
    %165 = vector.broadcast %164 : vector<8x1xf32> to vector<8x32xf32>
    %166 = arith.mulf %165, %45 : vector<8x32xf32>
    %c0_45 = arith.constant 0 : index
    %c288 = arith.constant 288 : index
    %167 = vector.load %arg16[%c0_45, %c288] : memref<1x1024xf32, #tpu.memory_space<vmem>>, vector<1x32xf32>
    %cst_46 = arith.constant dense<0.000000e+00> : vector<8x32xf32>
    %168 = tpu.matmul %54, %166, %cst_46 {dimension_numbers = #tpu.dot_dimension_numbers<[1], [0], [0], [1], [0, 0, 1, 1], [], []>} : vector<8x8xf32>, vector<8x32xf32>, vector<8x32xf32> -> vector<8x32xf32>
    %169 = vector.broadcast %167 : vector<1x32xf32> to vector<8x32xf32>
    %170 = arith.addf %169, %168 : vector<8x32xf32>
    %171 = vector.extract_strided_slice %44 {offsets = [0, 9], sizes = [8, 1], strides = [1, 1]} : vector<8x32xf32> to vector<8x1xf32>
    %172 = vector.broadcast %171 : vector<8x1xf32> to vector<8x32xf32>
    %173 = arith.mulf %172, %170 : vector<8x32xf32>
    %174 = arith.addf %163, %173 : vector<8x32xf32>
    %175 = vector.extract_strided_slice %37 {offsets = [0, 10], sizes = [8, 1], strides = [1, 1]} : vector<8x32xf32> to vector<8x1xf32>
    %176 = vector.broadcast %175 : vector<8x1xf32> to vector<8x32xf32>
    %177 = arith.mulf %176, %45 : vector<8x32xf32>
    %c0_47 = arith.constant 0 : index
    %c320 = arith.constant 320 : index
    %178 = vector.load %arg16[%c0_47, %c320] : memref<1x1024xf32, #tpu.memory_space<vmem>>, vector<1x32xf32>
    %cst_48 = arith.constant dense<0.000000e+00> : vector<8x32xf32>
    %179 = tpu.matmul %54, %177, %cst_48 {dimension_numbers = #tpu.dot_dimension_numbers<[1], [0], [0], [1], [0, 0, 1, 1], [], []>} : vector<8x8xf32>, vector<8x32xf32>, vector<8x32xf32> -> vector<8x32xf32>
    %180 = vector.broadcast %178 : vector<1x32xf32> to vector<8x32xf32>
    %181 = arith.addf %180, %179 : vector<8x32xf32>
    %182 = vector.extract_strided_slice %44 {offsets = [0, 10], sizes = [8, 1], strides = [1, 1]} : vector<8x32xf32> to vector<8x1xf32>
    %183 = vector.broadcast %182 : vector<8x1xf32> to vector<8x32xf32>
    %184 = arith.mulf %183, %181 : vector<8x32xf32>
    %185 = arith.addf %174, %184 : vector<8x32xf32>
    %186 = vector.extract_strided_slice %37 {offsets = [0, 11], sizes = [8, 1], strides = [1, 1]} : vector<8x32xf32> to vector<8x1xf32>
    %187 = vector.broadcast %186 : vector<8x1xf32> to vector<8x32xf32>
    %188 = arith.mulf %187, %45 : vector<8x32xf32>
    %c0_49 = arith.constant 0 : index
    %c352 = arith.constant 352 : index
    %189 = vector.load %arg16[%c0_49, %c352] : memref<1x1024xf32, #tpu.memory_space<vmem>>, vector<1x32xf32>
    %cst_50 = arith.constant dense<0.000000e+00> : vector<8x32xf32>
    %190 = tpu.matmul %54, %188, %cst_50 {dimension_numbers = #tpu.dot_dimension_numbers<[1], [0], [0], [1], [0, 0, 1, 1], [], []>} : vector<8x8xf32>, vector<8x32xf32>, vector<8x32xf32> -> vector<8x32xf32>
    %191 = vector.broadcast %189 : vector<1x32xf32> to vector<8x32xf32>
    %192 = arith.addf %191, %190 : vector<8x32xf32>
    %193 = vector.extract_strided_slice %44 {offsets = [0, 11], sizes = [8, 1], strides = [1, 1]} : vector<8x32xf32> to vector<8x1xf32>
    %194 = vector.broadcast %193 : vector<8x1xf32> to vector<8x32xf32>
    %195 = arith.mulf %194, %192 : vector<8x32xf32>
    %196 = arith.addf %185, %195 : vector<8x32xf32>
    %197 = vector.extract_strided_slice %37 {offsets = [0, 12], sizes = [8, 1], strides = [1, 1]} : vector<8x32xf32> to vector<8x1xf32>
    %198 = vector.broadcast %197 : vector<8x1xf32> to vector<8x32xf32>
    %199 = arith.mulf %198, %45 : vector<8x32xf32>
    %c0_51 = arith.constant 0 : index
    %c384 = arith.constant 384 : index
    %200 = vector.load %arg16[%c0_51, %c384] : memref<1x1024xf32, #tpu.memory_space<vmem>>, vector<1x32xf32>
    %cst_52 = arith.constant dense<0.000000e+00> : vector<8x32xf32>
    %201 = tpu.matmul %54, %199, %cst_52 {dimension_numbers = #tpu.dot_dimension_numbers<[1], [0], [0], [1], [0, 0, 1, 1], [], []>} : vector<8x8xf32>, vector<8x32xf32>, vector<8x32xf32> -> vector<8x32xf32>
    %202 = vector.broadcast %200 : vector<1x32xf32> to vector<8x32xf32>
    %203 = arith.addf %202, %201 : vector<8x32xf32>
    %204 = vector.extract_strided_slice %44 {offsets = [0, 12], sizes = [8, 1], strides = [1, 1]} : vector<8x32xf32> to vector<8x1xf32>
    %205 = vector.broadcast %204 : vector<8x1xf32> to vector<8x32xf32>
    %206 = arith.mulf %205, %203 : vector<8x32xf32>
    %207 = arith.addf %196, %206 : vector<8x32xf32>
    %208 = vector.extract_strided_slice %37 {offsets = [0, 13], sizes = [8, 1], strides = [1, 1]} : vector<8x32xf32> to vector<8x1xf32>
    %209 = vector.broadcast %208 : vector<8x1xf32> to vector<8x32xf32>
    %210 = arith.mulf %209, %45 : vector<8x32xf32>
    %c0_53 = arith.constant 0 : index
    %c416 = arith.constant 416 : index
    %211 = vector.load %arg16[%c0_53, %c416] : memref<1x1024xf32, #tpu.memory_space<vmem>>, vector<1x32xf32>
    %cst_54 = arith.constant dense<0.000000e+00> : vector<8x32xf32>
    %212 = tpu.matmul %54, %210, %cst_54 {dimension_numbers = #tpu.dot_dimension_numbers<[1], [0], [0], [1], [0, 0, 1, 1], [], []>} : vector<8x8xf32>, vector<8x32xf32>, vector<8x32xf32> -> vector<8x32xf32>
    %213 = vector.broadcast %211 : vector<1x32xf32> to vector<8x32xf32>
    %214 = arith.addf %213, %212 : vector<8x32xf32>
    %215 = vector.extract_strided_slice %44 {offsets = [0, 13], sizes = [8, 1], strides = [1, 1]} : vector<8x32xf32> to vector<8x1xf32>
    %216 = vector.broadcast %215 : vector<8x1xf32> to vector<8x32xf32>
    %217 = arith.mulf %216, %214 : vector<8x32xf32>
    %218 = arith.addf %207, %217 : vector<8x32xf32>
    %219 = vector.extract_strided_slice %37 {offsets = [0, 14], sizes = [8, 1], strides = [1, 1]} : vector<8x32xf32> to vector<8x1xf32>
    %220 = vector.broadcast %219 : vector<8x1xf32> to vector<8x32xf32>
    %221 = arith.mulf %220, %45 : vector<8x32xf32>
    %c0_55 = arith.constant 0 : index
    %c448 = arith.constant 448 : index
    %222 = vector.load %arg16[%c0_55, %c448] : memref<1x1024xf32, #tpu.memory_space<vmem>>, vector<1x32xf32>
    %cst_56 = arith.constant dense<0.000000e+00> : vector<8x32xf32>
    %223 = tpu.matmul %54, %221, %cst_56 {dimension_numbers = #tpu.dot_dimension_numbers<[1], [0], [0], [1], [0, 0, 1, 1], [], []>} : vector<8x8xf32>, vector<8x32xf32>, vector<8x32xf32> -> vector<8x32xf32>
    %224 = vector.broadcast %222 : vector<1x32xf32> to vector<8x32xf32>
    %225 = arith.addf %224, %223 : vector<8x32xf32>
    %226 = vector.extract_strided_slice %44 {offsets = [0, 14], sizes = [8, 1], strides = [1, 1]} : vector<8x32xf32> to vector<8x1xf32>
    %227 = vector.broadcast %226 : vector<8x1xf32> to vector<8x32xf32>
    %228 = arith.mulf %227, %225 : vector<8x32xf32>
    %229 = arith.addf %218, %228 : vector<8x32xf32>
    %230 = vector.extract_strided_slice %37 {offsets = [0, 15], sizes = [8, 1], strides = [1, 1]} : vector<8x32xf32> to vector<8x1xf32>
    %231 = vector.broadcast %230 : vector<8x1xf32> to vector<8x32xf32>
    %232 = arith.mulf %231, %45 : vector<8x32xf32>
    %c0_57 = arith.constant 0 : index
    %c480 = arith.constant 480 : index
    %233 = vector.load %arg16[%c0_57, %c480] : memref<1x1024xf32, #tpu.memory_space<vmem>>, vector<1x32xf32>
    %cst_58 = arith.constant dense<0.000000e+00> : vector<8x32xf32>
    %234 = tpu.matmul %54, %232, %cst_58 {dimension_numbers = #tpu.dot_dimension_numbers<[1], [0], [0], [1], [0, 0, 1, 1], [], []>} : vector<8x8xf32>, vector<8x32xf32>, vector<8x32xf32> -> vector<8x32xf32>
    %235 = vector.broadcast %233 : vector<1x32xf32> to vector<8x32xf32>
    %236 = arith.addf %235, %234 : vector<8x32xf32>
    %237 = vector.extract_strided_slice %44 {offsets = [0, 15], sizes = [8, 1], strides = [1, 1]} : vector<8x32xf32> to vector<8x1xf32>
    %238 = vector.broadcast %237 : vector<8x1xf32> to vector<8x32xf32>
    %239 = arith.mulf %238, %236 : vector<8x32xf32>
    %240 = arith.addf %229, %239 : vector<8x32xf32>
    %241 = vector.extract_strided_slice %37 {offsets = [0, 16], sizes = [8, 1], strides = [1, 1]} : vector<8x32xf32> to vector<8x1xf32>
    %242 = vector.broadcast %241 : vector<8x1xf32> to vector<8x32xf32>
    %243 = arith.mulf %242, %45 : vector<8x32xf32>
    %c0_59 = arith.constant 0 : index
    %c512 = arith.constant 512 : index
    %244 = vector.load %arg16[%c0_59, %c512] : memref<1x1024xf32, #tpu.memory_space<vmem>>, vector<1x32xf32>
    %cst_60 = arith.constant dense<0.000000e+00> : vector<8x32xf32>
    %245 = tpu.matmul %54, %243, %cst_60 {dimension_numbers = #tpu.dot_dimension_numbers<[1], [0], [0], [1], [0, 0, 1, 1], [], []>} : vector<8x8xf32>, vector<8x32xf32>, vector<8x32xf32> -> vector<8x32xf32>
    %246 = vector.broadcast %244 : vector<1x32xf32> to vector<8x32xf32>
    %247 = arith.addf %246, %245 : vector<8x32xf32>
    %248 = vector.extract_strided_slice %44 {offsets = [0, 16], sizes = [8, 1], strides = [1, 1]} : vector<8x32xf32> to vector<8x1xf32>
    %249 = vector.broadcast %248 : vector<8x1xf32> to vector<8x32xf32>
    %250 = arith.mulf %249, %247 : vector<8x32xf32>
    %251 = arith.addf %240, %250 : vector<8x32xf32>
    %252 = vector.extract_strided_slice %37 {offsets = [0, 17], sizes = [8, 1], strides = [1, 1]} : vector<8x32xf32> to vector<8x1xf32>
    %253 = vector.broadcast %252 : vector<8x1xf32> to vector<8x32xf32>
    %254 = arith.mulf %253, %45 : vector<8x32xf32>
    %c0_61 = arith.constant 0 : index
    %c544 = arith.constant 544 : index
    %255 = vector.load %arg16[%c0_61, %c544] : memref<1x1024xf32, #tpu.memory_space<vmem>>, vector<1x32xf32>
    %cst_62 = arith.constant dense<0.000000e+00> : vector<8x32xf32>
    %256 = tpu.matmul %54, %254, %cst_62 {dimension_numbers = #tpu.dot_dimension_numbers<[1], [0], [0], [1], [0, 0, 1, 1], [], []>} : vector<8x8xf32>, vector<8x32xf32>, vector<8x32xf32> -> vector<8x32xf32>
    %257 = vector.broadcast %255 : vector<1x32xf32> to vector<8x32xf32>
    %258 = arith.addf %257, %256 : vector<8x32xf32>
    %259 = vector.extract_strided_slice %44 {offsets = [0, 17], sizes = [8, 1], strides = [1, 1]} : vector<8x32xf32> to vector<8x1xf32>
    %260 = vector.broadcast %259 : vector<8x1xf32> to vector<8x32xf32>
    %261 = arith.mulf %260, %258 : vector<8x32xf32>
    %262 = arith.addf %251, %261 : vector<8x32xf32>
    %263 = vector.extract_strided_slice %37 {offsets = [0, 18], sizes = [8, 1], strides = [1, 1]} : vector<8x32xf32> to vector<8x1xf32>
    %264 = vector.broadcast %263 : vector<8x1xf32> to vector<8x32xf32>
    %265 = arith.mulf %264, %45 : vector<8x32xf32>
    %c0_63 = arith.constant 0 : index
    %c576 = arith.constant 576 : index
    %266 = vector.load %arg16[%c0_63, %c576] : memref<1x1024xf32, #tpu.memory_space<vmem>>, vector<1x32xf32>
    %cst_64 = arith.constant dense<0.000000e+00> : vector<8x32xf32>
    %267 = tpu.matmul %54, %265, %cst_64 {dimension_numbers = #tpu.dot_dimension_numbers<[1], [0], [0], [1], [0, 0, 1, 1], [], []>} : vector<8x8xf32>, vector<8x32xf32>, vector<8x32xf32> -> vector<8x32xf32>
    %268 = vector.broadcast %266 : vector<1x32xf32> to vector<8x32xf32>
    %269 = arith.addf %268, %267 : vector<8x32xf32>
    %270 = vector.extract_strided_slice %44 {offsets = [0, 18], sizes = [8, 1], strides = [1, 1]} : vector<8x32xf32> to vector<8x1xf32>
    %271 = vector.broadcast %270 : vector<8x1xf32> to vector<8x32xf32>
    %272 = arith.mulf %271, %269 : vector<8x32xf32>
    %273 = arith.addf %262, %272 : vector<8x32xf32>
    %274 = vector.extract_strided_slice %37 {offsets = [0, 19], sizes = [8, 1], strides = [1, 1]} : vector<8x32xf32> to vector<8x1xf32>
    %275 = vector.broadcast %274 : vector<8x1xf32> to vector<8x32xf32>
    %276 = arith.mulf %275, %45 : vector<8x32xf32>
    %c0_65 = arith.constant 0 : index
    %c608 = arith.constant 608 : index
    %277 = vector.load %arg16[%c0_65, %c608] : memref<1x1024xf32, #tpu.memory_space<vmem>>, vector<1x32xf32>
    %cst_66 = arith.constant dense<0.000000e+00> : vector<8x32xf32>
    %278 = tpu.matmul %54, %276, %cst_66 {dimension_numbers = #tpu.dot_dimension_numbers<[1], [0], [0], [1], [0, 0, 1, 1], [], []>} : vector<8x8xf32>, vector<8x32xf32>, vector<8x32xf32> -> vector<8x32xf32>
    %279 = vector.broadcast %277 : vector<1x32xf32> to vector<8x32xf32>
    %280 = arith.addf %279, %278 : vector<8x32xf32>
    %281 = vector.extract_strided_slice %44 {offsets = [0, 19], sizes = [8, 1], strides = [1, 1]} : vector<8x32xf32> to vector<8x1xf32>
    %282 = vector.broadcast %281 : vector<8x1xf32> to vector<8x32xf32>
    %283 = arith.mulf %282, %280 : vector<8x32xf32>
    %284 = arith.addf %273, %283 : vector<8x32xf32>
    %285 = vector.extract_strided_slice %37 {offsets = [0, 20], sizes = [8, 1], strides = [1, 1]} : vector<8x32xf32> to vector<8x1xf32>
    %286 = vector.broadcast %285 : vector<8x1xf32> to vector<8x32xf32>
    %287 = arith.mulf %286, %45 : vector<8x32xf32>
    %c0_67 = arith.constant 0 : index
    %c640 = arith.constant 640 : index
    %288 = vector.load %arg16[%c0_67, %c640] : memref<1x1024xf32, #tpu.memory_space<vmem>>, vector<1x32xf32>
    %cst_68 = arith.constant dense<0.000000e+00> : vector<8x32xf32>
    %289 = tpu.matmul %54, %287, %cst_68 {dimension_numbers = #tpu.dot_dimension_numbers<[1], [0], [0], [1], [0, 0, 1, 1], [], []>} : vector<8x8xf32>, vector<8x32xf32>, vector<8x32xf32> -> vector<8x32xf32>
    %290 = vector.broadcast %288 : vector<1x32xf32> to vector<8x32xf32>
    %291 = arith.addf %290, %289 : vector<8x32xf32>
    %292 = vector.extract_strided_slice %44 {offsets = [0, 20], sizes = [8, 1], strides = [1, 1]} : vector<8x32xf32> to vector<8x1xf32>
    %293 = vector.broadcast %292 : vector<8x1xf32> to vector<8x32xf32>
    %294 = arith.mulf %293, %291 : vector<8x32xf32>
    %295 = arith.addf %284, %294 : vector<8x32xf32>
    %296 = vector.extract_strided_slice %37 {offsets = [0, 21], sizes = [8, 1], strides = [1, 1]} : vector<8x32xf32> to vector<8x1xf32>
    %297 = vector.broadcast %296 : vector<8x1xf32> to vector<8x32xf32>
    %298 = arith.mulf %297, %45 : vector<8x32xf32>
    %c0_69 = arith.constant 0 : index
    %c672 = arith.constant 672 : index
    %299 = vector.load %arg16[%c0_69, %c672] : memref<1x1024xf32, #tpu.memory_space<vmem>>, vector<1x32xf32>
    %cst_70 = arith.constant dense<0.000000e+00> : vector<8x32xf32>
    %300 = tpu.matmul %54, %298, %cst_70 {dimension_numbers = #tpu.dot_dimension_numbers<[1], [0], [0], [1], [0, 0, 1, 1], [], []>} : vector<8x8xf32>, vector<8x32xf32>, vector<8x32xf32> -> vector<8x32xf32>
    %301 = vector.broadcast %299 : vector<1x32xf32> to vector<8x32xf32>
    %302 = arith.addf %301, %300 : vector<8x32xf32>
    %303 = vector.extract_strided_slice %44 {offsets = [0, 21], sizes = [8, 1], strides = [1, 1]} : vector<8x32xf32> to vector<8x1xf32>
    %304 = vector.broadcast %303 : vector<8x1xf32> to vector<8x32xf32>
    %305 = arith.mulf %304, %302 : vector<8x32xf32>
    %306 = arith.addf %295, %305 : vector<8x32xf32>
    %307 = vector.extract_strided_slice %37 {offsets = [0, 22], sizes = [8, 1], strides = [1, 1]} : vector<8x32xf32> to vector<8x1xf32>
    %308 = vector.broadcast %307 : vector<8x1xf32> to vector<8x32xf32>
    %309 = arith.mulf %308, %45 : vector<8x32xf32>
    %c0_71 = arith.constant 0 : index
    %c704 = arith.constant 704 : index
    %310 = vector.load %arg16[%c0_71, %c704] : memref<1x1024xf32, #tpu.memory_space<vmem>>, vector<1x32xf32>
    %cst_72 = arith.constant dense<0.000000e+00> : vector<8x32xf32>
    %311 = tpu.matmul %54, %309, %cst_72 {dimension_numbers = #tpu.dot_dimension_numbers<[1], [0], [0], [1], [0, 0, 1, 1], [], []>} : vector<8x8xf32>, vector<8x32xf32>, vector<8x32xf32> -> vector<8x32xf32>
    %312 = vector.broadcast %310 : vector<1x32xf32> to vector<8x32xf32>
    %313 = arith.addf %312, %311 : vector<8x32xf32>
    %314 = vector.extract_strided_slice %44 {offsets = [0, 22], sizes = [8, 1], strides = [1, 1]} : vector<8x32xf32> to vector<8x1xf32>
    %315 = vector.broadcast %314 : vector<8x1xf32> to vector<8x32xf32>
    %316 = arith.mulf %315, %313 : vector<8x32xf32>
    %317 = arith.addf %306, %316 : vector<8x32xf32>
    %318 = vector.extract_strided_slice %37 {offsets = [0, 23], sizes = [8, 1], strides = [1, 1]} : vector<8x32xf32> to vector<8x1xf32>
    %319 = vector.broadcast %318 : vector<8x1xf32> to vector<8x32xf32>
    %320 = arith.mulf %319, %45 : vector<8x32xf32>
    %c0_73 = arith.constant 0 : index
    %c736 = arith.constant 736 : index
    %321 = vector.load %arg16[%c0_73, %c736] : memref<1x1024xf32, #tpu.memory_space<vmem>>, vector<1x32xf32>
    %cst_74 = arith.constant dense<0.000000e+00> : vector<8x32xf32>
    %322 = tpu.matmul %54, %320, %cst_74 {dimension_numbers = #tpu.dot_dimension_numbers<[1], [0], [0], [1], [0, 0, 1, 1], [], []>} : vector<8x8xf32>, vector<8x32xf32>, vector<8x32xf32> -> vector<8x32xf32>
    %323 = vector.broadcast %321 : vector<1x32xf32> to vector<8x32xf32>
    %324 = arith.addf %323, %322 : vector<8x32xf32>
    %325 = vector.extract_strided_slice %44 {offsets = [0, 23], sizes = [8, 1], strides = [1, 1]} : vector<8x32xf32> to vector<8x1xf32>
    %326 = vector.broadcast %325 : vector<8x1xf32> to vector<8x32xf32>
    %327 = arith.mulf %326, %324 : vector<8x32xf32>
    %328 = arith.addf %317, %327 : vector<8x32xf32>
    %329 = vector.extract_strided_slice %37 {offsets = [0, 24], sizes = [8, 1], strides = [1, 1]} : vector<8x32xf32> to vector<8x1xf32>
    %330 = vector.broadcast %329 : vector<8x1xf32> to vector<8x32xf32>
    %331 = arith.mulf %330, %45 : vector<8x32xf32>
    %c0_75 = arith.constant 0 : index
    %c768 = arith.constant 768 : index
    %332 = vector.load %arg16[%c0_75, %c768] : memref<1x1024xf32, #tpu.memory_space<vmem>>, vector<1x32xf32>
    %cst_76 = arith.constant dense<0.000000e+00> : vector<8x32xf32>
    %333 = tpu.matmul %54, %331, %cst_76 {dimension_numbers = #tpu.dot_dimension_numbers<[1], [0], [0], [1], [0, 0, 1, 1], [], []>} : vector<8x8xf32>, vector<8x32xf32>, vector<8x32xf32> -> vector<8x32xf32>
    %334 = vector.broadcast %332 : vector<1x32xf32> to vector<8x32xf32>
    %335 = arith.addf %334, %333 : vector<8x32xf32>
    %336 = vector.extract_strided_slice %44 {offsets = [0, 24], sizes = [8, 1], strides = [1, 1]} : vector<8x32xf32> to vector<8x1xf32>
    %337 = vector.broadcast %336 : vector<8x1xf32> to vector<8x32xf32>
    %338 = arith.mulf %337, %335 : vector<8x32xf32>
    %339 = arith.addf %328, %338 : vector<8x32xf32>
    %340 = vector.extract_strided_slice %37 {offsets = [0, 25], sizes = [8, 1], strides = [1, 1]} : vector<8x32xf32> to vector<8x1xf32>
    %341 = vector.broadcast %340 : vector<8x1xf32> to vector<8x32xf32>
    %342 = arith.mulf %341, %45 : vector<8x32xf32>
    %c0_77 = arith.constant 0 : index
    %c800 = arith.constant 800 : index
    %343 = vector.load %arg16[%c0_77, %c800] : memref<1x1024xf32, #tpu.memory_space<vmem>>, vector<1x32xf32>
    %cst_78 = arith.constant dense<0.000000e+00> : vector<8x32xf32>
    %344 = tpu.matmul %54, %342, %cst_78 {dimension_numbers = #tpu.dot_dimension_numbers<[1], [0], [0], [1], [0, 0, 1, 1], [], []>} : vector<8x8xf32>, vector<8x32xf32>, vector<8x32xf32> -> vector<8x32xf32>
    %345 = vector.broadcast %343 : vector<1x32xf32> to vector<8x32xf32>
    %346 = arith.addf %345, %344 : vector<8x32xf32>
    %347 = vector.extract_strided_slice %44 {offsets = [0, 25], sizes = [8, 1], strides = [1, 1]} : vector<8x32xf32> to vector<8x1xf32>
    %348 = vector.broadcast %347 : vector<8x1xf32> to vector<8x32xf32>
    %349 = arith.mulf %348, %346 : vector<8x32xf32>
    %350 = arith.addf %339, %349 : vector<8x32xf32>
    %351 = vector.extract_strided_slice %37 {offsets = [0, 26], sizes = [8, 1], strides = [1, 1]} : vector<8x32xf32> to vector<8x1xf32>
    %352 = vector.broadcast %351 : vector<8x1xf32> to vector<8x32xf32>
    %353 = arith.mulf %352, %45 : vector<8x32xf32>
    %c0_79 = arith.constant 0 : index
    %c832 = arith.constant 832 : index
    %354 = vector.load %arg16[%c0_79, %c832] : memref<1x1024xf32, #tpu.memory_space<vmem>>, vector<1x32xf32>
    %cst_80 = arith.constant dense<0.000000e+00> : vector<8x32xf32>
    %355 = tpu.matmul %54, %353, %cst_80 {dimension_numbers = #tpu.dot_dimension_numbers<[1], [0], [0], [1], [0, 0, 1, 1], [], []>} : vector<8x8xf32>, vector<8x32xf32>, vector<8x32xf32> -> vector<8x32xf32>
    %356 = vector.broadcast %354 : vector<1x32xf32> to vector<8x32xf32>
    %357 = arith.addf %356, %355 : vector<8x32xf32>
    %358 = vector.extract_strided_slice %44 {offsets = [0, 26], sizes = [8, 1], strides = [1, 1]} : vector<8x32xf32> to vector<8x1xf32>
    %359 = vector.broadcast %358 : vector<8x1xf32> to vector<8x32xf32>
    %360 = arith.mulf %359, %357 : vector<8x32xf32>
    %361 = arith.addf %350, %360 : vector<8x32xf32>
    %362 = vector.extract_strided_slice %37 {offsets = [0, 27], sizes = [8, 1], strides = [1, 1]} : vector<8x32xf32> to vector<8x1xf32>
    %363 = vector.broadcast %362 : vector<8x1xf32> to vector<8x32xf32>
    %364 = arith.mulf %363, %45 : vector<8x32xf32>
    %c0_81 = arith.constant 0 : index
    %c864 = arith.constant 864 : index
    %365 = vector.load %arg16[%c0_81, %c864] : memref<1x1024xf32, #tpu.memory_space<vmem>>, vector<1x32xf32>
    %cst_82 = arith.constant dense<0.000000e+00> : vector<8x32xf32>
    %366 = tpu.matmul %54, %364, %cst_82 {dimension_numbers = #tpu.dot_dimension_numbers<[1], [0], [0], [1], [0, 0, 1, 1], [], []>} : vector<8x8xf32>, vector<8x32xf32>, vector<8x32xf32> -> vector<8x32xf32>
    %367 = vector.broadcast %365 : vector<1x32xf32> to vector<8x32xf32>
    %368 = arith.addf %367, %366 : vector<8x32xf32>
    %369 = vector.extract_strided_slice %44 {offsets = [0, 27], sizes = [8, 1], strides = [1, 1]} : vector<8x32xf32> to vector<8x1xf32>
    %370 = vector.broadcast %369 : vector<8x1xf32> to vector<8x32xf32>
    %371 = arith.mulf %370, %368 : vector<8x32xf32>
    %372 = arith.addf %361, %371 : vector<8x32xf32>
    %373 = vector.extract_strided_slice %37 {offsets = [0, 28], sizes = [8, 1], strides = [1, 1]} : vector<8x32xf32> to vector<8x1xf32>
    %374 = vector.broadcast %373 : vector<8x1xf32> to vector<8x32xf32>
    %375 = arith.mulf %374, %45 : vector<8x32xf32>
    %c0_83 = arith.constant 0 : index
    %c896 = arith.constant 896 : index
    %376 = vector.load %arg16[%c0_83, %c896] : memref<1x1024xf32, #tpu.memory_space<vmem>>, vector<1x32xf32>
    %cst_84 = arith.constant dense<0.000000e+00> : vector<8x32xf32>
    %377 = tpu.matmul %54, %375, %cst_84 {dimension_numbers = #tpu.dot_dimension_numbers<[1], [0], [0], [1], [0, 0, 1, 1], [], []>} : vector<8x8xf32>, vector<8x32xf32>, vector<8x32xf32> -> vector<8x32xf32>
    %378 = vector.broadcast %376 : vector<1x32xf32> to vector<8x32xf32>
    %379 = arith.addf %378, %377 : vector<8x32xf32>
    %380 = vector.extract_strided_slice %44 {offsets = [0, 28], sizes = [8, 1], strides = [1, 1]} : vector<8x32xf32> to vector<8x1xf32>
    %381 = vector.broadcast %380 : vector<8x1xf32> to vector<8x32xf32>
    %382 = arith.mulf %381, %379 : vector<8x32xf32>
    %383 = arith.addf %372, %382 : vector<8x32xf32>
    %384 = vector.extract_strided_slice %37 {offsets = [0, 29], sizes = [8, 1], strides = [1, 1]} : vector<8x32xf32> to vector<8x1xf32>
    %385 = vector.broadcast %384 : vector<8x1xf32> to vector<8x32xf32>
    %386 = arith.mulf %385, %45 : vector<8x32xf32>
    %c0_85 = arith.constant 0 : index
    %c928 = arith.constant 928 : index
    %387 = vector.load %arg16[%c0_85, %c928] : memref<1x1024xf32, #tpu.memory_space<vmem>>, vector<1x32xf32>
    %cst_86 = arith.constant dense<0.000000e+00> : vector<8x32xf32>
    %388 = tpu.matmul %54, %386, %cst_86 {dimension_numbers = #tpu.dot_dimension_numbers<[1], [0], [0], [1], [0, 0, 1, 1], [], []>} : vector<8x8xf32>, vector<8x32xf32>, vector<8x32xf32> -> vector<8x32xf32>
    %389 = vector.broadcast %387 : vector<1x32xf32> to vector<8x32xf32>
    %390 = arith.addf %389, %388 : vector<8x32xf32>
    %391 = vector.extract_strided_slice %44 {offsets = [0, 29], sizes = [8, 1], strides = [1, 1]} : vector<8x32xf32> to vector<8x1xf32>
    %392 = vector.broadcast %391 : vector<8x1xf32> to vector<8x32xf32>
    %393 = arith.mulf %392, %390 : vector<8x32xf32>
    %394 = arith.addf %383, %393 : vector<8x32xf32>
    %395 = vector.extract_strided_slice %37 {offsets = [0, 30], sizes = [8, 1], strides = [1, 1]} : vector<8x32xf32> to vector<8x1xf32>
    %396 = vector.broadcast %395 : vector<8x1xf32> to vector<8x32xf32>
    %397 = arith.mulf %396, %45 : vector<8x32xf32>
    %c0_87 = arith.constant 0 : index
    %c960 = arith.constant 960 : index
    %398 = vector.load %arg16[%c0_87, %c960] : memref<1x1024xf32, #tpu.memory_space<vmem>>, vector<1x32xf32>
    %cst_88 = arith.constant dense<0.000000e+00> : vector<8x32xf32>
    %399 = tpu.matmul %54, %397, %cst_88 {dimension_numbers = #tpu.dot_dimension_numbers<[1], [0], [0], [1], [0, 0, 1, 1], [], []>} : vector<8x8xf32>, vector<8x32xf32>, vector<8x32xf32> -> vector<8x32xf32>
    %400 = vector.broadcast %398 : vector<1x32xf32> to vector<8x32xf32>
    %401 = arith.addf %400, %399 : vector<8x32xf32>
    %402 = vector.extract_strided_slice %44 {offsets = [0, 30], sizes = [8, 1], strides = [1, 1]} : vector<8x32xf32> to vector<8x1xf32>
    %403 = vector.broadcast %402 : vector<8x1xf32> to vector<8x32xf32>
    %404 = arith.mulf %403, %401 : vector<8x32xf32>
    %405 = arith.addf %394, %404 : vector<8x32xf32>
    %406 = vector.extract_strided_slice %37 {offsets = [0, 31], sizes = [8, 1], strides = [1, 1]} : vector<8x32xf32> to vector<8x1xf32>
    %407 = vector.broadcast %406 : vector<8x1xf32> to vector<8x32xf32>
    %408 = arith.mulf %407, %45 : vector<8x32xf32>
    %c0_89 = arith.constant 0 : index
    %c992 = arith.constant 992 : index
    %409 = vector.load %arg16[%c0_89, %c992] : memref<1x1024xf32, #tpu.memory_space<vmem>>, vector<1x32xf32>
    %cst_90 = arith.constant dense<0.000000e+00> : vector<8x32xf32>
    %410 = tpu.matmul %54, %408, %cst_90 {dimension_numbers = #tpu.dot_dimension_numbers<[1], [0], [0], [1], [0, 0, 1, 1], [], []>} : vector<8x8xf32>, vector<8x32xf32>, vector<8x32xf32> -> vector<8x32xf32>
    %411 = vector.broadcast %409 : vector<1x32xf32> to vector<8x32xf32>
    %412 = arith.addf %411, %410 : vector<8x32xf32>
    %413 = vector.extract_strided_slice %44 {offsets = [0, 31], sizes = [8, 1], strides = [1, 1]} : vector<8x32xf32> to vector<8x1xf32>
    %414 = vector.broadcast %413 : vector<8x1xf32> to vector<8x32xf32>
    %415 = arith.mulf %414, %412 : vector<8x32xf32>
    %416 = arith.addf %405, %415 : vector<8x32xf32>
    %417 = tpu.concatenate %71, %82, %93, %104, %115, %126, %137, %148, %159, %170, %181, %192, %203, %214, %225, %236 in 1 : vector<8x32xf32>, vector<8x32xf32>, vector<8x32xf32>, vector<8x32xf32>, vector<8x32xf32>, vector<8x32xf32>, vector<8x32xf32>, vector<8x32xf32>, vector<8x32xf32>, vector<8x32xf32>, vector<8x32xf32>, vector<8x32xf32>, vector<8x32xf32>, vector<8x32xf32>, vector<8x32xf32>, vector<8x32xf32> -> vector<8x512xf32>
    %418 = tpu.concatenate %247, %258, %269, %280, %291, %302, %313, %324, %335, %346, %357, %368, %379, %390, %401, %412 in 1 : vector<8x32xf32>, vector<8x32xf32>, vector<8x32xf32>, vector<8x32xf32>, vector<8x32xf32>, vector<8x32xf32>, vector<8x32xf32>, vector<8x32xf32>, vector<8x32xf32>, vector<8x32xf32>, vector<8x32xf32>, vector<8x32xf32>, vector<8x32xf32>, vector<8x32xf32>, vector<8x32xf32>, vector<8x32xf32> -> vector<8x512xf32>
    %419 = tpu.concatenate %417, %418 in 1 : vector<8x512xf32>, vector<8x512xf32> -> vector<8x1024xf32>
    %c0_91 = arith.constant 0 : index
    %c0_92 = arith.constant 0 : index
    %c0_93 = arith.constant 0 : index
    %420 = vector.load %arg14[%c0_91, %c0_92, %c0_93] : memref<1x8x1024xf32, #tpu.memory_space<vmem>>, vector<1x8x1024xf32>
    %421 = vector.shape_cast %420 : vector<1x8x1024xf32> to vector<8x1024xf32>
    %422 = vector.shape_cast %419 : vector<8x1024xf32> to vector<1x8x1024xf32>
    tpu.vector_store %arg14[%c0_91, %c0_92, %c0_93], %422 {strides = array<i32>} : memref<1x8x1024xf32, #tpu.memory_space<vmem>>, vector<1x8x1024xf32>,
    %423 = vector.extract_strided_slice %419 {offsets = [7, 0], sizes = [1, 1024], strides = [1, 1]} : vector<8x1024xf32> to vector<1x1024xf32>
    %c0_94 = arith.constant 0 : index
    %c0_95 = arith.constant 0 : index
    %424 = vector.load %arg16[%c0_94, %c0_95] : memref<1x1024xf32, #tpu.memory_space<vmem>>, vector<1x1024xf32>
    tpu.vector_store %arg16[%c0_94, %c0_95], %423 {strides = array<i32>} : memref<1x1024xf32, #tpu.memory_space<vmem>>, vector<1x1024xf32>,
    %c0_96 = arith.constant 0 : index
    %c0_97 = arith.constant 0 : index
    %c0_98 = arith.constant 0 : index
    %425 = vector.load %arg15[%c0_96, %c0_97, %c0_98] : memref<1x8x32xf32, #tpu.memory_space<vmem>>, vector<1x8x32xf32>
    %426 = vector.shape_cast %425 : vector<1x8x32xf32> to vector<8x32xf32>
    %427 = vector.shape_cast %58 : vector<8x32xf32> to vector<1x8x32xf32>
    tpu.vector_store %arg15[%c0_96, %c0_97, %c0_98], %427 {strides = array<i32>} : memref<1x8x32xf32, #tpu.memory_space<vmem>>, vector<1x8x32xf32>,
    %428 = vector.extract_strided_slice %58 {offsets = [7, 0], sizes = [1, 32], strides = [1, 1]} : vector<8x32xf32> to vector<1x32xf32>
    %c0_99 = arith.constant 0 : index
    %c0_100 = arith.constant 0 : index
    %429 = vector.load %arg17[%c0_99, %c0_100] : memref<1x32xf32, #tpu.memory_space<vmem>>, vector<1x32xf32>
    tpu.vector_store %arg17[%c0_99, %c0_100], %428 {strides = array<i32>} : memref<1x32xf32, #tpu.memory_space<vmem>>, vector<1x32xf32>,
    %430 = tpu.reciprocal %63 : vector<8x1xf32> -> vector<8x1xf32>
    %431 = vector.broadcast %430 : vector<8x1xf32> to vector<8x32xf32>
    %432 = arith.mulf %416, %431 : vector<8x32xf32>
    %c0_101 = arith.constant 0 : index
    %c0_102 = arith.constant 0 : index
    %433 = vector.load %arg7[%c0_101, %c0_102] : memref<32x32xf32, #tpu.memory_space<vmem>>, vector<32x32xf32>
    %cst_103 = arith.constant dense<0.000000e+00> : vector<8x32xf32>
    %434 = tpu.matmul %432, %433, %cst_103 {dimension_numbers = #tpu.dot_dimension_numbers<[1], [0], [0], [1], [0, 0, 1, 1], [], []>} : vector<8x32xf32>, vector<32x32xf32>, vector<8x32xf32> -> vector<8x32xf32>
    %c0_104 = arith.constant 0 : index
    %c0_105 = arith.constant 0 : index
    %435 = vector.load %arg8[%c0_104, %c0_105] : memref<1x32xf32, #tpu.memory_space<vmem>>, vector<1x32xf32>
    %436 = vector.broadcast %435 : vector<1x32xf32> to vector<8x32xf32>
    %437 = arith.addf %434, %436 : vector<8x32xf32>
    %cst_106 = arith.constant 0.000000e+00 : f32
    %438 = vector.broadcast %cst_106 : f32 to vector<8x32xf32>
    %439 = arith.maximumf %437, %438 : vector<8x32xf32>
    %c0_107 = arith.constant 0 : index
    %c0_108 = arith.constant 0 : index
    %440 = vector.load %arg9[%c0_107, %c0_108] : memref<32x32xf32, #tpu.memory_space<vmem>>, vector<32x32xf32>
    %cst_109 = arith.constant dense<0.000000e+00> : vector<8x32xf32>
    %441 = tpu.matmul %439, %440, %cst_109 {dimension_numbers = #tpu.dot_dimension_numbers<[1], [0], [0], [1], [0, 0, 1, 1], [], []>} : vector<8x32xf32>, vector<32x32xf32>, vector<8x32xf32> -> vector<8x32xf32>
    %c0_110 = arith.constant 0 : index
    %c0_111 = arith.constant 0 : index
    %442 = vector.load %arg10[%c0_110, %c0_111] : memref<1x32xf32, #tpu.memory_space<vmem>>, vector<1x32xf32>
    %443 = vector.broadcast %442 : vector<1x32xf32> to vector<8x32xf32>
    %444 = arith.addf %441, %443 : vector<8x32xf32>
    %cst_112 = arith.constant 0.000000e+00 : f32
    %445 = vector.broadcast %cst_112 : f32 to vector<8x32xf32>
    %446 = arith.maximumf %444, %445 : vector<8x32xf32>
    %447 = arith.addf %446, %49 : vector<8x32xf32>
    %c0_113 = arith.constant 0 : index
    %c0_114 = arith.constant 0 : index
    %c0_115 = arith.constant 0 : index
    %448 = vector.load %arg13[%c0_113, %c0_114, %c0_115] : memref<1x8x32xf32, #tpu.memory_space<vmem>>, vector<1x8x32xf32>
    %449 = vector.shape_cast %448 : vector<1x8x32xf32> to vector<8x32xf32>
    %450 = vector.shape_cast %447 : vector<8x32xf32> to vector<1x8x32xf32>
    tpu.vector_store %arg13[%c0_113, %c0_114, %c0_115], %450 {strides = array<i32>} : memref<1x8x32xf32, #tpu.memory_space<vmem>>, vector<1x8x32xf32>,
    return
  }
  func.func @transform_0(%arg0: i32, %arg1: i32) -> (i32, i32, i32) {
    %c0_i32 = arith.constant 0 : i32
    %c0_i32_0 = arith.constant 0 : i32
    return %arg0, %arg1, %c0_i32 : i32, i32, i32
  }
  func.func @transform_1(%arg0: i32, %arg1: i32) -> (i32, i32) {
    %c0_i32 = arith.constant 0 : i32
    %c0_i32_0 = arith.constant 0 : i32
    %c0_i32_1 = arith.constant 0 : i32
    return %c0_i32, %c0_i32_0 : i32, i32
  }
  func.func @transform_2(%arg0: i32, %arg1: i32) -> (i32, i32) {
    %c0_i32 = arith.constant 0 : i32
    %c0_i32_0 = arith.constant 0 : i32
    %c0_i32_1 = arith.constant 0 : i32
    return %c0_i32, %c0_i32_0 : i32, i32
  }
  func.func @transform_3(%arg0: i32, %arg1: i32) -> (i32, i32) {
    %c0_i32 = arith.constant 0 : i32
    %c0_i32_0 = arith.constant 0 : i32
    %c0_i32_1 = arith.constant 0 : i32
    return %c0_i32, %c0_i32_0 : i32, i32
  }
  func.func @transform_4(%arg0: i32, %arg1: i32) -> (i32, i32) {
    %c0_i32 = arith.constant 0 : i32
    %c0_i32_0 = arith.constant 0 : i32
    %c0_i32_1 = arith.constant 0 : i32
    return %c0_i32, %c0_i32_0 : i32, i32
  }
  func.func @transform_5(%arg0: i32, %arg1: i32) -> (i32, i32) {
    %c0_i32 = arith.constant 0 : i32
    %c0_i32_0 = arith.constant 0 : i32
    %c0_i32_1 = arith.constant 0 : i32
    return %c0_i32, %c0_i32_0 : i32, i32
  }
  func.func @transform_6(%arg0: i32, %arg1: i32) -> (i32, i32) {
    %c0_i32 = arith.constant 0 : i32
    %c0_i32_0 = arith.constant 0 : i32
    %c0_i32_1 = arith.constant 0 : i32
    return %c0_i32, %c0_i32_0 : i32, i32
  }
  func.func @transform_7(%arg0: i32, %arg1: i32) -> (i32, i32) {
    %c0_i32 = arith.constant 0 : i32
    %c0_i32_0 = arith.constant 0 : i32
    %c0_i32_1 = arith.constant 0 : i32
    return %c0_i32, %c0_i32_0 : i32, i32
  }
  func.func @transform_8(%arg0: i32, %arg1: i32) -> (i32, i32) {
    %c0_i32 = arith.constant 0 : i32
    %c0_i32_0 = arith.constant 0 : i32
    %c0_i32_1 = arith.constant 0 : i32
    return %c0_i32, %c0_i32_0 : i32, i32
  }
  func.func @transform_9(%arg0: i32, %arg1: i32) -> (i32, i32, i32) {
    %c0_i32 = arith.constant 0 : i32
    %c0_i32_0 = arith.constant 0 : i32
    %c0_i32_1 = arith.constant 0 : i32
    return %arg0, %c0_i32, %c0_i32_0 : i32, i32, i32
  }
  func.func @transform_10(%arg0: i32, %arg1: i32) -> (i32, i32, i32) {
    %c0_i32 = arith.constant 0 : i32
    %c0_i32_0 = arith.constant 0 : i32
    %c0_i32_1 = arith.constant 0 : i32
    return %arg0, %c0_i32, %c0_i32_0 : i32, i32, i32
  }
  func.func @transform_11(%arg0: i32, %arg1: i32) -> (i32, i32, i32) {
    %c0_i32 = arith.constant 0 : i32
    %c0_i32_0 = arith.constant 0 : i32
    return %arg0, %arg1, %c0_i32 : i32, i32, i32
  }
  func.func @transform_12(%arg0: i32, %arg1: i32) -> (i32, i32, i32) {
    %c0_i32 = arith.constant 0 : i32
    %c0_i32_0 = arith.constant 0 : i32
    return %arg0, %arg1, %c0_i32 : i32, i32, i32
  }
  func.func @transform_13(%arg0: i32, %arg1: i32) -> (i32, i32, i32) {
    %c0_i32 = arith.constant 0 : i32
    %c0_i32_0 = arith.constant 0 : i32
    return %arg0, %arg1, %c0_i32 : i32, i32, i32
  }
}

</mosaic_0001>

<bundles_post_ra>
// kernel: linear_attention_block.1
= control target key start
LH: loop header
LB: loop body
LE: loop exit
PB: predicated region body
PF: predicated region fallthrough
CT: control target
= control target key end

     0   :  { %s5931_s0 = inlined_call_operand.vmem [shape: f32[2,16,16], index: 0, kind: input, shape index: {}]   ;;  %s5932_s1 = inlined_call_operand.vmem [shape: f32[1,16], index: 1, kind: input, shape index: {}]   ;;  %s5933_s2 = inlined_call_operand.vmem [shape: f32[1,16], index: 2, kind: input, shape index: {}]   ;;  %s5934_s3 = inlined_call_operand.vmem [shape: f32[16,128], index: 3, kind: input, shape index: {}]   ;;  %s5935_s4 = inlined_call_operand.vmem [shape: f32[1,32], index: 4, kind: input, shape index: {}]   ;;  %s5936_s5 = inlined_call_operand.vmem [shape: f32[32,32], index: 5, kind: input, shape index: {}]   ;;  %s5937_s6 = inlined_call_operand.vmem [shape: f32[1,32], index: 6, kind: input, shape index: {}]   ;;  %s5938_s7 = inlined_call_operand.vmem [shape: f32[32,32], index: 7, kind: input, shape index: {}]   ;;  %s5939_s8 = inlined_call_operand.vmem [shape: f32[1,32], index: 8, kind: input, shape index: {}]   ;;  %s5940_s9 = inlined_call_operand.vmem [shape: f32[2,1,1024], index: 9, kind: input, shape index: {}]   ;;  %s5941_s10 = inlined_call_operand.vmem [shape: f32[2,1,32], index: 10, kind: input, shape index: {}]   ;;  %s5942_s11 = inlined_call_operand.hbm [shape: f32[2,16,32], index: 11, kind: output, shape index: {0}]   ;;  %s5943_s12 = inlined_call_operand.vmem [shape: f32[2,16,1024], index: 12, kind: output, shape index: {1}]   ;;  %s5944_s13 = inlined_call_operand.hbm [shape: f32[2,16,32], index: 13, kind: output, shape index: {2}]  }
   0x1   :  { %5964 = sst [smem:[#allocation23_spill]] %s5936_s5 }
   0x2   :  { %5965 = sst [smem:[#allocation24_spill]] %s5937_s6 }
   0x3   :  { %5966 = sst [smem:[#allocation25_spill]] %s5938_s7 }
   0x4   :  { %5967 = sst [smem:[#allocation26_spill]] %s5939_s8 }
   0x5   :  { %5968 = sst [smem:[#allocation27_spill]] %s5942_s11 }
   0x6   :  { %5969 = sst [smem:[#allocation28_spill]] %s5944_s13 }
   0x7   :  { %19 = vsyncpa [#allocation5], 0 }
   0x8   :  { %21 = vsyncpa [#allocation5 + $0x1], 0 }
   0x9   :  { %22 = vsyncpa [#allocation7], 0 }
   0xa   :  { %24 = vsyncpa [#allocation7 + $0x1], 0  ;;  %s5111_s25 = smov 0   ;;  %s5113_s26 = smov 0  }
   0xb   :  { %s5115_s27 = smov 0   ;;  %s5117_s28 = smov 0  }
   0xc   :  { %s5119_s29 = smov 0   ;;  %s5121_s30 = smov 0  }
   0xd   :  { %s5123_s14 = smov 0   ;;  %s5125_s15 = smov 0  }
   0xe LB: > { %5970 = sst [smem:[#allocation10_spill]] %s4938_s25  ;;  %s4261_s16 = sadd.s32 4294967295, %s4966_s15   ;;  %s4966_s15 = sphi %s5125_s15, %s30_s15   ;;  %s4962_s14 = sphi %s5123_s14, %s6003_s14   ;;  %s4958_s30 = sphi %s5121_s30, %s6002_s30   ;;  %s4954_s29 = sphi %s5119_s29, %s6001_s29   ;;  %s4950_s28 = sphi %s5117_s28, %s6000_s28   ;;  %s4946_s27 = sphi %s5115_s27, %s5999_s27   ;;  %s4942_s26 = sphi %s5113_s26, %s5998_s26   ;;  %s4938_s25 = sphi %s5111_s25, %s5997_s25  }
   0xf   : > { %5971 = sst [smem:[#allocation11_spill]] %s4942_s26  ;;  %s4262_s17 = sadd.s32 4294967294, %s4966_s15  }
  0x10   : > { %5972 = sst [smem:[#allocation12_spill]] %s4946_s27  ;;  %s39_s18 = sadd.s32 1, %s4958_s30 }
  0x11   : > { %5973 = sst [smem:[#allocation13_spill]] %s4954_s29  ;;  %p40_p0 = scmp.ge.s32.totalorder %s39_s18, 2 }
  0x12   : > { %5974 = sst [smem:[#allocation14_spill]] %s4958_s30  ;;  %s42_s19 = sadd.s32 1, %s4962_s14 }
  0x13   : > { %5975 = sst [smem:[#allocation15_spill]] %s4962_s14  ;;  %p309_p1 = scmp.ne.s32.totalorder %s4946_s27, %s4942_s26 }
  0x14   : > { %5976 = sst [smem:[#allocation16_spill]] %s4966_s15  ;;  %p310_p2 = scmp.eq.s32.totalorder %s4261_s16, 3 }
  0x15   : > { %s6005_s18 = smov (%p40_p0, %s39_s18), 0  ;;  %s6007_s19 = smov (!%p40_p0, %s42_s19), %s4962_s14 }
  0x16   : > { %5977 = sst [smem:[#allocation17_spill]] %s6005_s18  ;;  %s295_s20 = ssub.s32 %s4958_s30, %s6005_s18 }
  0x17   : > { %p5162_p3 = por %p310_p2, %p309_p1  ;;  %p44_p4 = scmp.ge.s32.totalorder %s6007_s19, 2 }
  0x18   : > { %p315_p5 = scmp.ne.s32.totalorder %s4942_s26, %s4938_s25  ;;  %p316_p6 = scmp.eq.s32.totalorder %s4262_s17, 3 }
  0x19   : > { %s5978_s21 = scalar_select %p5162_p3, 1, 0 }
  0x1a   : > { %p4265_p7 = scmp.ge.s32.totalorder %s4966_s15, 1  ;;  %s6009_s19 = smov (%p44_p4, %s6007_s19), 0 }
  0x1b   : > { %5979 = sst [smem:[#allocation18_spill]] %s5978_s21  ;;  %p5171_p8 = por %p316_p6, %p315_p5 }
  0x1c   : > { %5980 = sst [smem:[#allocation19_spill]] %s6009_s19  ;;  %p438_p9 = scmp.lt.s32.totalorder %s4966_s15, 5 }
  0x1d   : > { %s5981_s22 = scalar_select %p5171_p8, 1, 0 }
  0x1e   : > { %s294_s23 = ssub.s32 %s4962_s14, %s6009_s19  ;;  %s299_s24 = sadd.s32 1, %s4946_s27 }
  0x1f   : > { %5982 = sst [smem:[#allocation20_spill]] %s5981_s22  ;;  %s296_s16 = sor.u32 %s295_s20, %s294_s23 }
  0x20   : > { %p439_p10 = pnand %p4265_p7, %p438_p9  ;;  %p297_p11 = scmp.eq.s32.totalorder %s296_s16, 0 }
  0x22   : > { %s5180_s18 = scalar_select %p297_p11, %s4946_s27, %s299_s24  }
  0x23   : > { %442 = sbr.rel (%p439_p10) target bundleno = 1904 (0x770), region = 64 }
  0x24   : > { %5983 = sst [smem:[#allocation21_spill]] %s5180_s18 }
  0x2a   : > { %s5183_s17 = sand.u32 1, %s4942_s26   ;;  %p506_p12 = scmp.lt.s32.totalorder %s4954_s29, 1 }
  0x2b   : > { %5984 = sst [smem:[#allocation22_spill]] %s5183_s17  ;;  %s4266_s30 = sshll.u32 %s5183_s17, 3 }
  0x2c   : > { %p508_p13 = scmp.lt.s32.totalorder %s4950_s28, 1  ;;  %s5204_s16 = scalar_lea.vmem [#allocation4], %s4266_s30 }
  0x2d   : > { %s507_s22 = scalar_select %p506_p12, %s4954_s29, 1 }
  0x2e   : > { %s509_s19 = scalar_select %p508_p13, %s4950_s28, 1 }
  0x2f   : > { %s4268_s14 = sshll.u32 %s507_s22, 1  ;;  %s4270_s20 = sshll.u32 %s507_s22, 3 }
  0x30   : > { %s511_s23 = sadd.s32 %s4268_s14, %s509_s19  ;;  %s517_s18 = scalar_lea.vmem %s5940_s9, %s4270_s20 }
  0x31   : > { %s4269_s27 = sshll.u32 %s511_s23, 3  ;;  %s520_s11 = scalar_lea.vmem %s5941_s10, %s507_s22 }
  0x32   : > { %s513_s13 = scalar_lea.vmem %s5931_s0, %s4269_s27  ;;  %s4271_s21 = sshll.u32 %s509_s19, 3 }
  0x33   : > { %s4272_s6 = sshll.u32 %s507_s22, 4  ;;  %s5206_s20 = scalar_lea.vmem [#allocation6], %s4266_s30 }
  0x34   : > { %s527_s17 = sadd.s32 %s4272_s6, %s4271_s21  ;;  %p4274_p0 = scmp.ne.s32.totalorder %s4950_s28, 0 }
  0x35   : > { %s4273_s29 = sshll.u32 %s527_s17, 3  ;;  %v534_v0 = vld [vmem:[%s517_s18] sm:$0xff] (!%p4274_p0)  ;;  %vm537_vm0 = vcmask (!%p4274_p0), 253952  }
  0x36   : > { %s5202_s14 = scalar_lea.vmem %s5943_s12, %s4273_s29  ;;  %533 = sbr.rel (%p4274_p0) target bundleno = 61 (0x3d), region = 68  ;;  %v536_v1 = vld [vmem:[%s520_s11] sm:$0x1] (!%p4274_p0)  ;;  %535 = vst [vmem:[#allocation2] sm:$0xff] (!%p4274_p0), %v534_v0 }
  0x37   : > { %538 = vst.msk [vmem:[#allocation3] sm:$0x1] (!%p4274_p0), %vm537_vm0, %v536_v1 }
  0x3d PF: > { %v539_v2 = vld [vmem:[%s513_s13] sm:$0xff]  ;;  %vm540_vm1 = vcmask 130048   ;;  %v572_v10 = vld [vmem:[%s5934_s3 + $0x8] sm:$0xff]  ;;  %v4968_v11 = vmov 0.0|0.0   ;;  %vm4969_vm2 = vmmov 0   ;;  %v4970_v13 = vmov 0.0  }
  0x3e   : > { %v541_v3 = vsel %vm540_vm1, %v539_v2, 0.0  ;;  %v571_v9 = vld [vmem:[%s5934_s3] sm:$0xff]  ;;  %4607 = vmatprep.subr.bf16.mxu0 %v4968_v11  ;;  %4417 = vmatprep.mubr.msk.f32.mxu0 %vm4969_vm2, %v4970_v13  ;;  %v4971_v23 = vmov 2   ;;  %v4972_v24 = vmov 0   ;;  %v661_v28 = vlaneseq  ;;  %s5005_s27 = smov 64   ;;  %s5024_s29 = smov 32  }
  0x3f   : > { %542 = vadd.xlane.f32.xlu0 %v541_v3  ;;  %v4608_v12 = vpack.c.bf16 %v572_v10, %v571_v9  ;;  %4420 = vmatprep.subr.mxu1 %v4970_v13  ;;  %v4275_v18 = vld [vmem:[%s5932_s1] ss:$0 sm:$0xff]  ;;  %vm669_vm5 = vcmask 64512   ;;  %v4973_v35 = vmov 14   ;;  %v4974_v36 = vmov 1   ;;  %s5028_s30 = smov 96  }
  0x40   : > { %4422 = vmatprep.mubr.msk.f32.mxu1 %vm4969_vm2, %v4970_v13  ;;  %v4276_v20 = vld [vmem:[%s5933_s2] ss:$0 sm:$0xff]  ;;  %4771 = vset.pattern.permute.xlu0 %v4971_v23  ;;  %v5236_v29 = vshrl.u32 %v661_v28, 7  ;;  %v664_v30 = vand.u32 127, %v661_v28  ;;  %v4975_v37 = vmov 17   ;;  %v4976_v38 = vmov 3  }
  0x41   : > { %4609 = vmatpush3.bf16.msra.mxu0 %v4608_v12  ;;  %4769 = vset.pattern.permute.xlu1 %v4972_v24  ;;  %v4977_v39 = vmov 20   ;;  %v4978_v40 = vmov 4   ;;  %v4979_v41 = vmov 23   ;;  %v4980_v42 = vmov 5   ;;  %s5985_s22 = sld [smem:[#allocation23_spill]]  ;;  %s5986_s11 = sld [smem:[#allocation25_spill]] }
  0x42   : > { %4430 = vmatprep.subr.mxu0 %v4970_v13  ;;  %vm665_vm3 = vcmp.ge.s32.totalorder %v5236_v29, %v664_v30  ;;  %v4981_v43 = vmov 26   ;;  %v4982_v44 = vmov 6   ;;  %v4983_v45 = vmov 29   ;;  %s5987_s26 = sld [smem:[#allocation13_spill]]  ;;  %s5988_s18 = sld [smem:[#allocation22_spill]] }
  0x43   : > { %v5244_v34 = vsel %vm665_vm3, 1.0, %v4970_v13  ;;  %v4984_v46 = vmov 7   ;;  %v4985_v47 = vmov 8   ;;  %v4986_v48 = vmov 9   ;;  %s5989_s17 = sld [smem:[#allocation24_spill]]  ;;  %s5991_s8 = sld [smem:[#allocation28_spill]] }
  0x44   : > { %v4987_v49 = vmov 10   ;;  %v4988_v50 = vmov 11   ;;  %v4989_v51 = vmov 12   ;;  %v4990_v52 = vmov 13   ;;  %s4087_s25 = sshll.u32 %s5206_s20, 4  ;;  %s4088_s25 = int_to_ptr.vmem [resolvable:$true] %s4087_s25 }
  0x45   : > { %v4991_v53 = vmov 15   ;;  %v4992_v54 = vmov 16   ;;  %v4993_v55 = vmov 18   ;;  %v4994_v56 = vmov 19  }
  0x46   : > { %v4995_v57 = vmov 21   ;;  %v4996_v58 = vmov 22   ;;  %v4997_v59 = vmov 24   ;;  %v4998_v60 = vmov 25  }
  0x47   : > { %v4999_v61 = vmov 27   ;;  %v5000_v62 = vmov 28   ;;  %v5001_v63 = vmov 30   ;;  %v5002_v0 = vmov 31  }
  0x48   : > { %v5003_v1 = vmov 34   ;;  %vm3859_vm6 = vcmask 261127   ;;  %vm759_vm7 = vcmask 261120   ;;  %vm3766_vm8 = vcmask 523264   ;;  %s4328_s24 = sshll.u32 %s5987_s26, 1  ;;  %s5039_s26 = smov [#allocation6]  }
  0x49   : > { %vm3768_vm9 = vcmask 785408  }
  0xcc   : > { %v543_v4 = vpop.xlane.xlu0 %542 }
  0xcd   : > { %v545_v5 = vmul.f32 0.0625, %v543_v4 }
  0xcf   : > { %v546_v6 = vsub.f32 %v539_v2, %v545_v5  ;;  %v5004_v2 = vmov 33  }
  0xd1   : > { %v547_v7 = vmul.f32 %v546_v6, %v546_v6 }
  0xd3   : > { %v548_v8 = vsel %vm540_vm1, %v547_v7, 0.0 }
  0xd4   : > { %549 = vadd.xlane.f32.xlu0 %v548_v8 }
 0x161   : > { %v550_v14 = vpop.xlane.xlu0 %549 }
 0x162   : > { %v551_v15 = vmul.f32 0.0625, %v550_v14 }
 0x164   : > { %v552_v16 = vadd.f32 1e-05, %v551_v15 }
 0x166   : > { %4834 = vrsqrt.f32 %v552_v16 }
 0x170   : > { %v4835_v17 = vpop.eup %4834 }
 0x171   : > { %v554_v19 = vmul.f32 %v4835_v17, %v546_v6 }
 0x173   : > { %v562_v21 = vmul.f32 %v4275_v18, %v554_v19 }
 0x175   : > { %v570_v22 = vadd.f32 %v4276_v20, %v562_v21 }
 0x177   : > { %4418 = vmatmul.mubr.msk.f32.vlgmr.msra.gmra.mrb[0].mxu0 %vm540_vm1, %v570_v22 }
 0x178   : > { %4432 = vmatprep.mubr.msk.f32.mxu0 %vm4969_vm2, %v4970_v13 }
 0x24a   : > { %v5233_v25 = vpop.f32.mrb[0].mxu0 }
 0x24b   : > { %v648_v26 = vmul.f32 1.442695, %v5233_v25  ;;  %v4419_v27 = vpop.f32.mrb[1].mxu0  ;;  %v647_v31 = vadd.f32 1.0, %v5233_v25  ;;  %vm646_vm4 = vcmp.gt.f32.partialorder %v5233_v25, 0.0 }
 0x24d   : > { %4836 = vpow2.f32 %v648_v26 }
 0x257   : > { %v4837_v32 = vpop.eup %4836 }
 0x258   : > { %v5241_v33 = vsel %vm646_vm4, %v647_v31, %v4837_v32 }
 0x259   : > { %953 = vperm.xlu0 %4771, %v5241_v33   ;;  %766 = vperm.xlu1 %4769, %v5241_v33  }
 0x25a   : > { %4421 = vmatpush3.msra.mxu1 %v5241_v33 }
 0x25b   : > { %4423 = vmatmul.mubr.msk.f32.vlgmr.msra.gmra.mrb[0].mxu1 %vm669_vm5, %v5244_v34  ;;  %4425 = vmatprep.subr.mxu1 %v4970_v13 }
 0x25c   : > { %4427 = vmatprep.mubr.msk.f32.mxu1 %vm4969_vm2, %v4970_v13 }
 0x25d   : > { %4783 = vset.pattern.permute.xlu0 %v4973_v35  ;;  %4770 = vset.pattern.permute.xlu1 %v4974_v36 }
 0x25e   : > { %2078 = vperm.xlu0 %4783, %v5241_v33   ;;  %859 = vperm.xlu1 %4770, %v5241_v33  }
 0x262   : > { %4786 = vset.pattern.permute.xlu0 %v4975_v37  ;;  %4772 = vset.pattern.permute.xlu1 %v4976_v38 }
 0x263   : > { %2359 = vperm.xlu0 %4786, %v5241_v33   ;;  %1047 = vperm.xlu1 %4772, %v5241_v33  }
 0x267   : > { %4789 = vset.pattern.permute.xlu0 %v4977_v39  ;;  %4773 = vset.pattern.permute.xlu1 %v4978_v40 }
 0x268   : > { %2641 = vperm.xlu0 %4789, %v5241_v33   ;;  %1141 = vperm.xlu1 %4773, %v5241_v33  }
 0x26c   : > { %4792 = vset.pattern.permute.xlu0 %v4979_v41  ;;  %4774 = vset.pattern.permute.xlu1 %v4980_v42 }
 0x26d   : > { %2922 = vperm.xlu0 %4792, %v5241_v33   ;;  %1234 = vperm.xlu1 %4774, %v5241_v33  }
 0x271   : > { %4795 = vset.pattern.permute.xlu0 %v4981_v43  ;;  %4775 = vset.pattern.permute.xlu1 %v4982_v44 }
 0x272   : > { %3203 = vperm.xlu0 %4795, %v5241_v33   ;;  %1328 = vperm.xlu1 %4775, %v5241_v33  }
 0x276   : > { %4798 = vset.pattern.permute.xlu0 %v4983_v45  ;;  %4776 = vset.pattern.permute.xlu1 %v4984_v46 }
 0x277   : > { %3484 = vperm.xlu0 %4798, %v5241_v33   ;;  %1422 = vperm.xlu1 %4776, %v5241_v33  }
 0x27b   : > { %4777 = vset.pattern.permute.xlu1 %v4985_v47  ;;  %4802 = vset.pattern.permute.xlu0 %v5003_v1 }
 0x27c   : > { %1516 = vperm.xlu1 %4777, %v5241_v33  }
 0x280   : > { %4778 = vset.pattern.permute.xlu1 %v4986_v48 }
 0x281   : > { %1609 = vperm.xlu1 %4778, %v5241_v33  }
 0x285   : > { %4779 = vset.pattern.permute.xlu1 %v4987_v49 }
 0x286   : > { %1703 = vperm.xlu1 %4779, %v5241_v33  }
 0x28a   : > { %4780 = vset.pattern.permute.xlu1 %v4988_v50 }
 0x28b   : > { %1797 = vperm.xlu1 %4780, %v5241_v33  }
 0x28f   : > { %4781 = vset.pattern.permute.xlu1 %v4989_v51  ;;  %v4281_v51 = vld [vmem:[#allocation3] ss:$0 sm:$0xff] }
 0x290   : > { %1891 = vperm.xlu1 %4781, %v5241_v33  }
 0x294   : > { %4782 = vset.pattern.permute.xlu1 %v4990_v52 }
 0x295   : > { %1984 = vperm.xlu1 %4782, %v5241_v33  }
 0x299   : > { %4784 = vset.pattern.permute.xlu1 %v4991_v53 }
 0x29a   : > { %2172 = vperm.xlu1 %4784, %v5241_v33  }
 0x29e   : > { %4785 = vset.pattern.permute.xlu1 %v4992_v54 }
 0x29f   : > { %2266 = vperm.xlu1 %4785, %v5241_v33  }
 0x2a3   : > { %4787 = vset.pattern.permute.xlu1 %v4993_v55 }
 0x2a4   : > { %2453 = vperm.xlu1 %4787, %v5241_v33  }
 0x2a8   : > { %4788 = vset.pattern.permute.xlu1 %v4994_v56 }
 0x2a9   : > { %2547 = vperm.xlu1 %4788, %v5241_v33  }
 0x2ad   : > { %4790 = vset.pattern.permute.xlu1 %v4995_v57 }
 0x2ae   : > { %2734 = vperm.xlu1 %4790, %v5241_v33  }
 0x2b2   : > { %4791 = vset.pattern.permute.xlu1 %v4996_v58 }
 0x2b3   : > { %2828 = vperm.xlu1 %4791, %v5241_v33  }
 0x2b7   : > { %4793 = vset.pattern.permute.xlu1 %v4997_v59 }
 0x2b8   : > { %3016 = vperm.xlu1 %4793, %v5241_v33  }
 0x2bc   : > { %4794 = vset.pattern.permute.xlu1 %v4998_v60 }
 0x2bd   : > { %3109 = vperm.xlu1 %4794, %v5241_v33  }
 0x2c1   : > { %4796 = vset.pattern.permute.xlu1 %v4999_v61 }
 0x2c2   : > { %3297 = vperm.xlu1 %4796, %v5241_v33  }
 0x2c6   : > { %4797 = vset.pattern.permute.xlu1 %v5000_v62 }
 0x2c7   : > { %3391 = vperm.xlu1 %4797, %v5241_v33  }
 0x2cb   : > { %4799 = vset.pattern.permute.xlu1 %v5001_v63 }
 0x2cc   : > { %3578 = vperm.xlu1 %4799, %v5241_v33  }
 0x2d0   : > { %4800 = vset.pattern.permute.xlu1 %v5002_v0 }
 0x2d1   : > { %3672 = vperm.xlu1 %4800, %v5241_v33  }
 0x2d5   : > { %4801 = vset.pattern.permute.xlu1 %v5004_v2 }
 0x2d8   : > { %v767_v3 = vpop.permute.xlu1 %766  ;;  %v954_v5 = vpop.permute.xlu0 %953 }
 0x2d9   : > { %v769_v4 = vmul.f32 %v767_v3, %v5233_v25  ;;  %v956_v6 = vmul.f32 %v954_v5, %v5233_v25 }
 0x2db   : > { %772 = vrot.lane.b32.xlu0 %v769_v4, %s5005_s27 }
 0x2dd   : > { %v860_v7 = vpop.permute.xlu1 %859  ;;  %v2079_v35 = vpop.permute.xlu0 %2078 }
 0x2de   : > { %v862_v8 = vmul.f32 %v860_v7, %v5233_v25  ;;  %v2081_v36 = vmul.f32 %v2079_v35, %v5233_v25 }
 0x2df   : > { %958 = vrot.lane.b32.xlu0 %v956_v6, %s5005_s27 }
 0x2e0   : > { %864 = vrot.lane.b32.xlu1 %v862_v8, %s5005_s27 }
 0x2e2   : > { %v1048_v9 = vpop.permute.xlu1 %1047  ;;  %v2360_v41 = vpop.permute.xlu0 %2359 }
 0x2e3   : > { %v1050_v10 = vmul.f32 %v1048_v9, %v5233_v25  ;;  %v2362_v42 = vmul.f32 %v2360_v41, %v5233_v25 }
 0x2e5   : > { %1052 = vrot.lane.b32.xlu1 %v1050_v10, %s5005_s27 }
 0x2e7   : > { %v1142_v12 = vpop.permute.xlu1 %1141  ;;  %v2642_v47 = vpop.permute.xlu0 %2641 }
 0x2e8   : > { %v1144_v14 = vmul.f32 %v1142_v12, %v5233_v25  ;;  %v2644_v48 = vmul.f32 %v2642_v47, %v5233_v25 }
 0x2ea   : > { %1147 = vrot.lane.b32.xlu0 %v1144_v14, %s5005_s27 }
 0x2ec   : > { %v1235_v15 = vpop.permute.xlu1 %1234  ;;  %v2923_v55 = vpop.permute.xlu0 %2922 }
 0x2ed   : > { %v1237_v16 = vmul.f32 %v1235_v15, %v5233_v25  ;;  %v2925_v58 = vmul.f32 %v2923_v55, %v5233_v25 }
 0x2ef   : > { %1239 = vrot.lane.b32.xlu1 %v1237_v16, %s5005_s27 }
 0x2f1   : > { %v1329_v17 = vpop.permute.xlu1 %1328  ;;  %v3204_v63 = vpop.permute.xlu0 %3203 }
 0x2f2   : > { %v1331_v18 = vmul.f32 %v1329_v17, %v5233_v25  ;;  %v3206_v0 = vmul.f32 %v3204_v63, %v5233_v25 }
 0x2f4   : > { %1333 = vrot.lane.b32.xlu0 %v1331_v18, %s5005_s27  ;;  %v5006_v18 = vmov 39  }
 0x2f6   : > { %v1423_v19 = vpop.permute.xlu1 %1422  ;;  %v3485_v5 = vpop.permute.xlu0 %3484 }
 0x2f7   : > { %v1425_v20 = vmul.f32 %v1423_v19, %v5233_v25  ;;  %v3487_v6 = vmul.f32 %v3485_v5, %v5233_v25 }
 0x2f9   : > { %1427 = vrot.lane.b32.xlu1 %v1425_v20, %s5005_s27  ;;  %v5007_v20 = vmov 41  }
 0x2fb   : > { %v1517_v21 = vpop.permute.xlu1 %1516 }
 0x2fc   : > { %v1519_v22 = vmul.f32 %v1517_v21, %v5233_v25  ;;  %v5008_v21 = vmov 35  }
 0x2fe   : > { %1522 = vrot.lane.b32.xlu0 %v1519_v22, %s5005_s27 }
 0x300   : > { %v1610_v23 = vpop.permute.xlu1 %1609 }
 0x301   : > { %v1612_v24 = vmul.f32 %v1610_v23, %v5233_v25  ;;  %v5009_v23 = vmov 43  }
 0x303   : > { %1614 = vrot.lane.b32.xlu1 %v1612_v24, %s5005_s27  ;;  %v5010_v24 = vmov 37  }
 0x305   : > { %v1704_v26 = vpop.permute.xlu1 %1703 }
 0x306   : > { %v1706_v27 = vmul.f32 %v1704_v26, %v5233_v25 }
 0x308   : > { %1708 = vrot.lane.b32.xlu0 %v1706_v27, %s5005_s27  ;;  %v5011_v27 = vmov 45  }
 0x30a   : > { %v1798_v28 = vpop.permute.xlu1 %1797 }
 0x30b   : > { %v1800_v30 = vmul.f32 %v1798_v28, %v5233_v25  ;;  %v5012_v28 = vmov 38  }
 0x30d   : > { %1802 = vrot.lane.b32.xlu1 %v1800_v30, %s5005_s27 }
 0x30f   : > { %v1892_v31 = vpop.permute.xlu1 %1891 }
 0x310   : > { %v1894_v32 = vmul.f32 %v1892_v31, %v5233_v25  ;;  %v5013_v31 = vmov 47  }
 0x312   : > { %1897 = vrot.lane.b32.xlu0 %v1894_v32, %s5005_s27  ;;  %v5014_v32 = vmov 42  }
 0x314   : > { %v1985_v37 = vpop.permute.xlu1 %1984 }
 0x315   : > { %v1987_v38 = vmul.f32 %v1985_v37, %v5233_v25  ;;  %v5016_v37 = vmov 46  }
 0x316   : > { %2083 = vrot.lane.b32.xlu0 %v2081_v36, %s5005_s27  ;;  %v5015_v36 = vmov 49  }
 0x317   : > { %1989 = vrot.lane.b32.xlu1 %v1987_v38, %s5005_s27 }
 0x319   : > { %v2173_v39 = vpop.permute.xlu1 %2172 }
 0x31a   : > { %v2175_v40 = vmul.f32 %v2173_v39, %v5233_v25  ;;  %v5017_v39 = vmov 51  }
 0x31c   : > { %2177 = vrot.lane.b32.xlu1 %v2175_v40, %s5005_s27  ;;  %v5018_v40 = vmov 50  }
 0x31e   : > { %v2267_v43 = vpop.permute.xlu1 %2266 }
 0x31f   : > { %v2269_v44 = vmul.f32 %v2267_v43, %v5233_v25  ;;  %v5020_v43 = vmov 54  }
 0x320   : > { %2364 = vrot.lane.b32.xlu1 %v2362_v42, %s5005_s27  ;;  %v5019_v42 = vmov 53  }
 0x321   : > { %2272 = vrot.lane.b32.xlu0 %v2269_v44, %s5005_s27 }
 0x323   : > { %v2454_v45 = vpop.permute.xlu1 %2453 }
 0x324   : > { %v2456_v46 = vmul.f32 %v2454_v45, %v5233_v25  ;;  %v5021_v45 = vmov 57  }
 0x326   : > { %2458 = vrot.lane.b32.xlu0 %v2456_v46, %s5005_s27  ;;  %v5022_v46 = vmov 55  }
 0x328   : > { %v2548_v49 = vpop.permute.xlu1 %2547 }
 0x329   : > { %v2550_v50 = vmul.f32 %v2548_v49, %v5233_v25 }
 0x32a   : > { %2647 = vrot.lane.b32.xlu0 %v2644_v48, %s5005_s27  ;;  %v5023_v48 = vmov 58  }
 0x32b   : > { %2552 = vrot.lane.b32.xlu1 %v2550_v50, %s5005_s27  ;;  %v5025_v50 = vmov 59  }
 0x32d   : > { %v2735_v52 = vpop.permute.xlu1 %2734 }
 0x32e   : > { %v2737_v53 = vmul.f32 %v2735_v52, %v5233_v25  ;;  %v739_v54 = vpop.f32.mrb[0].mxu1 }
 0x32f   : > { %v5327_v56 = vadd.f32 %v4281_v51, %v739_v54  ;;  %v4424_v57 = vpop.f32.mrb[1].mxu1 }
 0x330   : > { %2739 = vrot.lane.b32.xlu1 %v2737_v53, %s5005_s27 }
 0x331   : > { %3860 = vst.msk [vmem:[#allocation3 - $0x7] sm:$0x80] %vm3859_vm6, %v5327_v56 }
 0x332   : > { %v2829_v59 = vpop.permute.xlu1 %2828  ;;  %3858 = vst.msk [vmem:[%s5206_s20] sm:$0xff] %vm759_vm7, %v5327_v56 }
 0x333   : > { %v2831_v60 = vmul.f32 %v2829_v59, %v5233_v25 }
 0x334   : > { %2927 = vrot.lane.b32.xlu1 %v2925_v58, %s5005_s27 }
 0x335   : > { %2833 = vrot.lane.b32.xlu0 %v2831_v60, %s5005_s27 }
 0x337   : > { %v3017_v61 = vpop.permute.xlu1 %3016 }
 0x338   : > { %v3019_v62 = vmul.f32 %v3017_v61, %v5233_v25 }
 0x33a   : > { %3022 = vrot.lane.b32.xlu0 %v3019_v62, %s5005_s27  ;;  %v5026_v62 = vmov 32  }
 0x33c   : > { %v3110_v1 = vpop.permute.xlu1 %3109 }
 0x33d   : > { %v3112_v2 = vmul.f32 %v3110_v1, %v5233_v25 }
 0x33e   : > { %3208 = vrot.lane.b32.xlu0 %v3206_v0, %s5005_s27  ;;  %v5027_v0 = vmov 61  }
 0x33f   : > { %3114 = vrot.lane.b32.xlu1 %v3112_v2, %s5005_s27 }
 0x341   : > { %v3298_v3 = vpop.permute.xlu1 %3297 }
 0x342   : > { %v3300_v4 = vmul.f32 %v3298_v3, %v5233_v25 }
 0x344   : > { %3302 = vrot.lane.b32.xlu1 %v3300_v4, %s5005_s27 }
 0x346   : > { %v3392_v7 = vpop.permute.xlu1 %3391 }
 0x347   : > { %v3394_v8 = vmul.f32 %v3392_v7, %v5233_v25 }
 0x348   : > { %3489 = vrot.lane.b32.xlu1 %v3487_v6, %s5005_s27 }
 0x349   : > { %3397 = vrot.lane.b32.xlu0 %v3394_v8, %s5005_s27 }
 0x34b   : > { %v3579_v9 = vpop.permute.xlu1 %3578 }
 0x34c   : > { %v3581_v10 = vmul.f32 %v3579_v9, %v5233_v25 }
 0x34d   : > { %v773_v12 = vpop.permute.xlu0 %772 }
 0x34e   : > { %3583 = vrot.lane.b32.xlu0 %v3581_v10, %s5005_s27  ;;  %4426 = vmatpush3.msra.mxu1 %v773_v12 }
 0x34f   : > { %4428 = vmatmul.mubr.msk.f32.vlgmr.msra.gmra.mrb[2].mxu1 %vm669_vm5, %v5244_v34  ;;  %4435 = vmatprep.subr.mxu1 %v4970_v13 }
 0x350   : > { %v3673_v14 = vpop.permute.xlu1 %3672  ;;  %4437 = vmatprep.mubr.msk.f32.mxu1 %vm4969_vm2, %v4970_v13 }
 0x351   : > { %v3675_v15 = vmul.f32 %v3673_v14, %v5233_v25  ;;  %v959_v16 = vpop.permute.xlu0 %958 }
 0x352   : > { %1037 = vperm.xlu0 %4802, %v5241_v33   ;;  %4436 = vmatpush3.msra.mxu1 %v959_v16 }
 0x353   : > { %3677 = vrot.lane.b32.xlu1 %v3675_v15, %s5005_s27  ;;  %4438 = vmatmul.mubr.msk.f32.vlgmr.msra.gmra.mrb[4].mxu1 %vm669_vm5, %v5244_v34 }
 0x354   : > { %v865_v17 = vpop.permute.xlu1 %864  ;;  %4445 = vmatprep.subr.mxu1 %v4970_v13  ;;  %4447 = vmatprep.mubr.msk.f32.mxu1 %vm4969_vm2, %v4970_v13 }
 0x355   : > { %4431 = vmatpush3.msra.mxu0 %v865_v17 }
 0x356   : > { %4806 = vset.pattern.permute.xlu0 %v5006_v18  ;;  %4433 = vmatmul.mubr.msk.f32.vlgmr.msra.gmra.mrb[2].mxu0 %vm669_vm5, %v5244_v34 }
 0x357   : > { %1506 = vperm.xlu0 %4806, %v5241_v33   ;;  %943 = vperm.xlu1 %4801, %v5241_v33  }
 0x358   : > { %4440 = vmatprep.subr.mxu0 %v4970_v13  ;;  %v1053_v19 = vpop.permute.xlu1 %1052  ;;  %4442 = vmatprep.mubr.msk.f32.mxu0 %vm4969_vm2, %v4970_v13 }
 0x359   : > { %4441 = vmatpush3.msra.mxu0 %v1053_v19 }
 0x35a   : > { %4443 = vmatmul.mubr.msk.f32.vlgmr.msra.gmra.mrb[4].mxu0 %vm669_vm5, %v5244_v34  ;;  %4450 = vmatprep.subr.mxu0 %v4970_v13 }
 0x35b   : > { %4807 = vset.pattern.permute.xlu0 %v5007_v20  ;;  %4803 = vset.pattern.permute.xlu1 %v5008_v21 }
 0x35c   : > { %v1148_v22 = vpop.permute.xlu0 %1147  ;;  %1693 = vperm.xlu0 %4807, %v5241_v33   ;;  %1131 = vperm.xlu1 %4803, %v5241_v33  }
 0x35d   : > { %4446 = vmatpush3.msra.mxu1 %v1148_v22  ;;  %4452 = vmatprep.mubr.msk.f32.mxu0 %vm4969_vm2, %v4970_v13 }
 0x35e   : > { %4455 = vmatprep.subr.mxu1 %v4970_v13  ;;  %4448 = vmatmul.mubr.msk.f32.vlgmr.msra.gmra.mrb[6].mxu1 %vm669_vm5, %v5244_v34 }
 0x35f   : > { %4457 = vmatprep.mubr.msk.f32.mxu1 %vm4969_vm2, %v4970_v13 }
 0x360   : > { %4809 = vset.pattern.permute.xlu0 %v5009_v23  ;;  %4804 = vset.pattern.permute.xlu1 %v5010_v24 }
 0x361   : > { %1881 = vperm.xlu0 %4809, %v5241_v33   ;;  %1318 = vperm.xlu1 %4804, %v5241_v33   ;;  %v1240_v26 = vpop.permute.xlu1 %1239 }
 0x362   : > { %4451 = vmatpush3.msra.mxu0 %v1240_v26 }
 0x363   : > { %4460 = vmatprep.subr.mxu0 %v4970_v13  ;;  %4453 = vmatmul.mubr.msk.f32.vlgmr.msra.gmra.mrb[6].mxu0 %vm669_vm5, %v5244_v34 }
 0x364   : > { %4462 = vmatprep.mubr.msk.f32.mxu0 %vm4969_vm2, %v4970_v13 }
 0x365   : > { %4810 = vset.pattern.permute.xlu0 %v5011_v27  ;;  %4805 = vset.pattern.permute.xlu1 %v5012_v28 }
 0x366   : > { %v1334_v30 = vpop.permute.xlu0 %1333  ;;  %2068 = vperm.xlu0 %4810, %v5241_v33   ;;  %1412 = vperm.xlu1 %4805, %v5241_v33  }
 0x367   : > { %4456 = vmatpush3.msra.mxu1 %v1334_v30 }
 0x368   : > { %4465 = vmatprep.subr.mxu1 %v4970_v13  ;;  %4458 = vmatmul.mubr.msk.f32.vlgmr.msra.gmra.mrb[8].mxu1 %vm669_vm5, %v5244_v34 }
 0x369   : > { %4467 = vmatprep.mubr.msk.f32.mxu1 %vm4969_vm2, %v4970_v13 }
 0x36a   : > { %4812 = vset.pattern.permute.xlu0 %v5013_v31  ;;  %4808 = vset.pattern.permute.xlu1 %v5014_v32  ;;  %v5029_v31 = vmov 63  }
 0x36b   : > { %2256 = vperm.xlu0 %4812, %v5241_v33   ;;  %1787 = vperm.xlu1 %4808, %v5241_v33   ;;  %v1428_v35 = vpop.permute.xlu1 %1427 }
 0x36c   : > { %4461 = vmatpush3.msra.mxu0 %v1428_v35  ;;  %v5030_v35 = vmov 62  }
 0x36d   : > { %4470 = vmatprep.subr.mxu0 %v4970_v13  ;;  %4463 = vmatmul.mubr.msk.f32.vlgmr.msra.gmra.mrb[8].mxu0 %vm669_vm5, %v5244_v34 }
 0x36e   : > { %4472 = vmatprep.mubr.msk.f32.mxu0 %vm4969_vm2, %v4970_v13 }
 0x36f   : > { %4813 = vset.pattern.permute.xlu0 %v5015_v36  ;;  %4811 = vset.pattern.permute.xlu1 %v5016_v37  ;;  %v5031_v37 = vmov 36  }
 0x370   : > { %v1523_v38 = vpop.permute.xlu0 %1522  ;;  %2443 = vperm.xlu0 %4813, %v5241_v33   ;;  %2162 = vperm.xlu1 %4811, %v5241_v33  }
 0x371   : > { %4466 = vmatpush3.msra.mxu1 %v1523_v38 }
 0x372   : > { %4475 = vmatprep.subr.mxu1 %v4970_v13  ;;  %4468 = vmatmul.mubr.msk.f32.vlgmr.msra.gmra.mrb[10].mxu1 %vm669_vm5, %v5244_v34 }
 0x373   : > { %4477 = vmatprep.mubr.msk.f32.mxu1 %vm4969_vm2, %v4970_v13 }
 0x374   : > { %4815 = vset.pattern.permute.xlu0 %v5017_v39  ;;  %4814 = vset.pattern.permute.xlu1 %v5018_v40  ;;  %v5032_v39 = vmov 40  }
 0x375   : > { %2631 = vperm.xlu0 %4815, %v5241_v33   ;;  %2537 = vperm.xlu1 %4814, %v5241_v33   ;;  %v1615_v41 = vpop.permute.xlu1 %1614 }
 0x376   : > { %4471 = vmatpush3.msra.mxu0 %v1615_v41  ;;  %v5033_v41 = vmov 44  }
 0x377   : > { %4480 = vmatprep.subr.mxu0 %v4970_v13  ;;  %4473 = vmatmul.mubr.msk.f32.vlgmr.msra.gmra.mrb[10].mxu0 %vm669_vm5, %v5244_v34 }
 0x378   : > { %4482 = vmatprep.mubr.msk.f32.mxu0 %vm4969_vm2, %v4970_v13 }
 0x379   : > { %4816 = vset.pattern.permute.xlu0 %v5019_v42  ;;  %4817 = vset.pattern.permute.xlu1 %v5020_v43 }
 0x37a   : > { %v1709_v44 = vpop.permute.xlu0 %1708  ;;  %2818 = vperm.xlu0 %4816, %v5241_v33   ;;  %2912 = vperm.xlu1 %4817, %v5241_v33  }
 0x37b   : > { %4476 = vmatpush3.msra.mxu1 %v1709_v44  ;;  %v5034_v44 = vmov 48  }
 0x37c   : > { %4485 = vmatprep.subr.mxu1 %v4970_v13  ;;  %4478 = vmatmul.mubr.msk.f32.vlgmr.msra.gmra.mrb[12].mxu1 %vm669_vm5, %v5244_v34 }
 0x37d   : > { %4487 = vmatprep.mubr.msk.f32.mxu1 %vm4969_vm2, %v4970_v13 }
 0x37e   : > { %4819 = vset.pattern.permute.xlu0 %v5021_v45  ;;  %4818 = vset.pattern.permute.xlu1 %v5022_v46 }
 0x37f   : > { %3193 = vperm.xlu0 %4819, %v5241_v33   ;;  %3006 = vperm.xlu1 %4818, %v5241_v33   ;;  %v1803_v47 = vpop.permute.xlu1 %1802 }
 0x380   : > { %4481 = vmatpush3.msra.mxu0 %v1803_v47  ;;  %v5035_v47 = vmov 52  }
 0x381   : > { %4490 = vmatprep.subr.mxu0 %v4970_v13  ;;  %4483 = vmatmul.mubr.msk.f32.vlgmr.msra.gmra.mrb[12].mxu0 %vm669_vm5, %v5244_v34 }
 0x382   : > { %4492 = vmatprep.mubr.msk.f32.mxu0 %vm4969_vm2, %v4970_v13 }
 0x383   : > { %4820 = vset.pattern.permute.xlu1 %v5023_v48  ;;  %751 = vrot.lane.b32.xlu0 %v5327_v56, %s5024_s29 }
 0x384   : > { %v1898_v49 = vpop.permute.xlu0 %1897  ;;  %3287 = vperm.xlu1 %4820, %v5241_v33   ;;  %4821 = vset.pattern.permute.xlu0 %v5025_v50 }
 0x385   : > { %4486 = vmatpush3.msra.mxu1 %v1898_v49 }
 0x386   : > { %4495 = vmatprep.subr.mxu1 %v4970_v13  ;;  %4488 = vmatmul.mubr.msk.f32.vlgmr.msra.gmra.mrb[14].mxu1 %vm669_vm5, %v5244_v34 }
 0x387   : > { %3381 = vperm.xlu0 %4821, %v5241_v33   ;;  %4497 = vmatprep.mubr.msk.f32.mxu1 %vm4969_vm2, %v4970_v13 }
 0x388   : > { %v2084_v51 = vpop.permute.xlu0 %2083  ;;  %4823 = vset.pattern.permute.xlu1 %v5026_v62 }
 0x389   : > { %v1990_v52 = vpop.permute.xlu1 %1989  ;;  %4496 = vmatpush3.msra.mxu1 %v2084_v51 }
 0x38a   : > { %4491 = vmatpush3.msra.mxu0 %v1990_v52  ;;  %4505 = vmatprep.subr.mxu1 %v4970_v13 }
 0x38b   : > { %4500 = vmatprep.subr.mxu0 %v4970_v13  ;;  %4493 = vmatmul.mubr.msk.f32.vlgmr.msra.gmra.mrb[14].mxu0 %vm669_vm5, %v5244_v34 }
 0x38c   : > { %4502 = vmatprep.mubr.msk.f32.mxu0 %vm4969_vm2, %v4970_v13  ;;  %4498 = vmatmul.mubr.msk.f32.vlgmr.msra.gmra.mrb[16].mxu1 %vm669_vm5, %v5244_v34 }
 0x38d   : > { %4507 = vmatprep.mubr.msk.f32.mxu1 %vm4969_vm2, %v4970_v13  ;;  %4822 = vset.pattern.permute.xlu0 %v5027_v0 }
 0x38e   : > { %v2178_v53 = vpop.permute.xlu1 %2177 }
 0x38f   : > { %4501 = vmatpush3.msra.mxu0 %v2178_v53 }
 0x390   : > { %4510 = vmatprep.subr.mxu0 %v4970_v13  ;;  %4503 = vmatmul.mubr.msk.f32.vlgmr.msra.gmra.mrb[16].mxu0 %vm669_vm5, %v5244_v34 }
 0x391   : > { %4512 = vmatprep.mubr.msk.f32.mxu0 %vm4969_vm2, %v4970_v13 }
 0x392   : > { %v2365_v54 = vpop.permute.xlu1 %2364 }
 0x393   : > { %v2273_v55 = vpop.permute.xlu0 %2272  ;;  %4511 = vmatpush3.msra.mxu0 %v2365_v54 }
 0x394   : > { %4506 = vmatpush3.msra.mxu1 %v2273_v55  ;;  %4513 = vmatmul.mubr.msk.f32.vlgmr.msra.gmra.mrb[18].mxu0 %vm669_vm5, %v5244_v34 }
 0x395   : > { %4515 = vmatprep.subr.mxu1 %v4970_v13  ;;  %4508 = vmatmul.mubr.msk.f32.vlgmr.msra.gmra.mrb[18].mxu1 %vm669_vm5, %v5244_v34 }
 0x396   : > { %4517 = vmatprep.mubr.msk.f32.mxu1 %vm4969_vm2, %v4970_v13  ;;  %4520 = vmatprep.subr.mxu0 %v4970_v13 }
 0x397   : > { %4522 = vmatprep.mubr.msk.f32.mxu0 %vm4969_vm2, %v4970_v13 }
 0x398   : > { %v2459_v56 = vpop.permute.xlu0 %2458 }
 0x399   : > { %4516 = vmatpush3.msra.mxu1 %v2459_v56 }
 0x39a   : > { %4525 = vmatprep.subr.mxu1 %v4970_v13  ;;  %4518 = vmatmul.mubr.msk.f32.vlgmr.msra.gmra.mrb[20].mxu1 %vm669_vm5, %v5244_v34 }
 0x39b   : > { %4527 = vmatprep.mubr.msk.f32.mxu1 %vm4969_vm2, %v4970_v13 }
 0x39c   : > { %v2648_v57 = vpop.permute.xlu0 %2647 }
 0x39d   : > { %v2553_v58 = vpop.permute.xlu1 %2552  ;;  %4526 = vmatpush3.msra.mxu1 %v2648_v57 }
 0x39e   : > { %4521 = vmatpush3.msra.mxu0 %v2553_v58  ;;  %4535 = vmatprep.subr.mxu1 %v4970_v13 }
 0x39f   : > { %4523 = vmatmul.mubr.msk.f32.vlgmr.msra.gmra.mrb[20].mxu0 %vm669_vm5, %v5244_v34  ;;  %4530 = vmatprep.subr.mxu0 %v4970_v13 }
 0x3a0   : > { %4532 = vmatprep.mubr.msk.f32.mxu0 %vm4969_vm2, %v4970_v13  ;;  %4528 = vmatmul.mubr.msk.f32.vlgmr.msra.gmra.mrb[22].mxu1 %vm669_vm5, %v5244_v34 }
 0x3a1   : > { %4537 = vmatprep.mubr.msk.f32.mxu1 %vm4969_vm2, %v4970_v13 }
 0x3a2   : > { %v2740_v59 = vpop.permute.xlu1 %2739 }
 0x3a3   : > { %4531 = vmatpush3.msra.mxu0 %v2740_v59 }
 0x3a4   : > { %4533 = vmatmul.mubr.msk.f32.vlgmr.msra.gmra.mrb[22].mxu0 %vm669_vm5, %v5244_v34  ;;  %4540 = vmatprep.subr.mxu0 %v4970_v13 }
 0x3a5   : > { %4542 = vmatprep.mubr.msk.f32.mxu0 %vm4969_vm2, %v4970_v13 }
 0x3a6   : > { %v2928_v60 = vpop.permute.xlu1 %2927 }
 0x3a7   : > { %v2834_v61 = vpop.permute.xlu0 %2833  ;;  %4541 = vmatpush3.msra.mxu0 %v2928_v60 }
 0x3a8   : > { %4536 = vmatpush3.msra.mxu1 %v2834_v61  ;;  %4550 = vmatprep.subr.mxu0 %v4970_v13 }
 0x3a9   : > { %4545 = vmatprep.subr.mxu1 %v4970_v13  ;;  %4538 = vmatmul.mubr.msk.f32.vlgmr.msra.gmra.mrb[24].mxu1 %vm669_vm5, %v5244_v34 }
 0x3aa   : > { %4547 = vmatprep.mubr.msk.f32.mxu1 %vm4969_vm2, %v4970_v13  ;;  %4543 = vmatmul.mubr.msk.f32.vlgmr.msra.gmra.mrb[24].mxu0 %vm669_vm5, %v5244_v34 }
 0x3ab   : > { %4552 = vmatprep.mubr.msk.f32.mxu0 %vm4969_vm2, %v4970_v13 }
 0x3ac   : > { %v3023_v63 = vpop.permute.xlu0 %3022 }
 0x3ad   : > { %4546 = vmatpush3.msra.mxu1 %v3023_v63 }
 0x3ae   : > { %4555 = vmatprep.subr.mxu1 %v4970_v13  ;;  %4548 = vmatmul.mubr.msk.f32.vlgmr.msra.gmra.mrb[26].mxu1 %vm669_vm5, %v5244_v34 }
 0x3af   : > { %4557 = vmatprep.mubr.msk.f32.mxu1 %vm4969_vm2, %v4970_v13 }
 0x3b0   : > { %v3209_v1 = vpop.permute.xlu0 %3208 }
 0x3b1   : > { %v3115_v2 = vpop.permute.xlu1 %3114  ;;  %4556 = vmatpush3.msra.mxu1 %v3209_v1 }
 0x3b2   : > { %4551 = vmatpush3.msra.mxu0 %v3115_v2  ;;  %4558 = vmatmul.mubr.msk.f32.vlgmr.msra.gmra.mrb[28].mxu1 %vm669_vm5, %v5244_v34 }
 0x3b3   : > { %4560 = vmatprep.subr.mxu0 %v4970_v13  ;;  %4553 = vmatmul.mubr.msk.f32.vlgmr.msra.gmra.mrb[26].mxu0 %vm669_vm5, %v5244_v34 }
 0x3b4   : > { %4562 = vmatprep.mubr.msk.f32.mxu0 %vm4969_vm2, %v4970_v13  ;;  %4565 = vmatprep.subr.mxu1 %v4970_v13 }
 0x3b5   : > { %4567 = vmatprep.mubr.msk.f32.mxu1 %vm4969_vm2, %v4970_v13 }
 0x3b6   : > { %v3303_v3 = vpop.permute.xlu1 %3302 }
 0x3b7   : > { %4561 = vmatpush3.msra.mxu0 %v3303_v3 }
 0x3b8   : > { %4570 = vmatprep.subr.mxu0 %v4970_v13  ;;  %4563 = vmatmul.mubr.msk.f32.vlgmr.msra.gmra.mrb[28].mxu0 %vm669_vm5, %v5244_v34 }
 0x3b9   : > { %4572 = vmatprep.mubr.msk.f32.mxu0 %vm4969_vm2, %v4970_v13 }
 0x3ba   : > { %v3490_v4 = vpop.permute.xlu1 %3489 }
 0x3bb   : > { %v3398_v5 = vpop.permute.xlu0 %3397  ;;  %4571 = vmatpush3.msra.mxu0 %v3490_v4 }
 0x3bc   : > { %4566 = vmatpush3.msra.mxu1 %v3398_v5  ;;  %4573 = vmatmul.mubr.msk.f32.vlgmr.msra.gmra.mrb[30].mxu0 %vm669_vm5, %v5244_v34 }
 0x3bd   : > { %4568 = vmatmul.mubr.msk.f32.vlgmr.msra.gmra.mrb[30].mxu1 %vm669_vm5, %v5244_v34  ;;  %4575 = vmatprep.subr.mxu1 %v4970_v13 }
 0x3be   : > { %4577 = vmatprep.mubr.msk.f32.mxu1 %vm4969_vm2, %v4970_v13  ;;  %4580 = vmatprep.subr.mxu0 %v4970_v13 }
 0x3bf   : > { %4582 = vmatprep.mubr.msk.f32.mxu0 %vm4969_vm2, %v4970_v13 }
 0x3c0   : > { %v3584_v6 = vpop.permute.xlu0 %3583 }
 0x3c1   : > { %4576 = vmatpush3.msra.mxu1 %v3584_v6 }
 0x3c2   : > { %4578 = vmatmul.mubr.msk.f32.vlgmr.msra.gmra.mrb[32].mxu1 %vm669_vm5, %v5244_v34  ;;  %4610 = vmatprep.subr.bf16.mxu1 %v4968_v11 }
 0x3c3   : > { %4593 = vmatprep.mubr.msk.f32.mxu1 %vm4969_vm2, %v4970_v13 }
 0x3c5   : > { %v3678_v7 = vpop.permute.xlu1 %3677 }
 0x3c6   : > { %4581 = vmatpush3.msra.mxu0 %v3678_v7 }
 0x3c7   : > { %4583 = vmatmul.mubr.msk.f32.vlgmr.msra.gmra.mrb[32].mxu0 %vm669_vm5, %v5244_v34  ;;  %4616 = vmatprep.subr.bf16.mxu0 %v4968_v11 }
 0x3c8   : > { %4604 = vmatprep.mubr.msk.f32.mxu0 %vm4969_vm2, %v4970_v13 }
 0x3d1   : > { %v5537_v8 = vpop.permute.xlu0 %1037 }
 0x3d6   : > { %v5539_v9 = vpop.permute.xlu0 %1506  ;;  %v5585_v60 = vpop.permute.xlu1 %943 }
 0x3db   : > { %v5541_v10 = vpop.permute.xlu0 %1693  ;;  %v5588_v0 = vpop.permute.xlu1 %1131 }
 0x3e0   : > { %v5543_v12 = vpop.permute.xlu0 %1881  ;;  %v5594_v5 = vpop.permute.xlu1 %1318 }
 0x3e5   : > { %v5545_v14 = vpop.permute.xlu0 %2068 }
 0x3ea   : > { %v5547_v15 = vpop.permute.xlu0 %2256 }
 0x3ef   : > { %v5549_v16 = vpop.permute.xlu0 %2443 }
 0x3f4   : > { %v5551_v34 = vpop.permute.xlu0 %2631 }
 0x3f9   : > { %v5553_v17 = vpop.permute.xlu0 %2818 }
 0x3fe   : > { %v5555_v18 = vpop.permute.xlu0 %3193 }
 0x402   : > { %v752_v13 = vpop.permute.xlu0 %751 }
 0x403   : > { %v754_v19 = vmul.f32 %v752_v13, %v5241_v33  ;;  %v5036_v13 = vmov 56  }
 0x405   : > { %756 = vrot.lane.b32.xlu0 %v754_v19, %s5028_s30  ;;  %v5597_v19 = vpop.permute.xlu1 %1412 }
 0x422   : > { %v5559_v20 = vpop.f32.mrb[2].mxu1 }
 0x423   : > { %v4429_v21 = vpop.f32.mrb[3].mxu1 }
 0x426   : > { %v1027_v22 = vpop.f32.mrb[4].mxu1 }
 0x427   : > { %1032 = vrot.lane.b32.xlu0 %v1027_v22, %s5005_s27  ;;  %v4439_v23 = vpop.f32.mrb[5].mxu1 }
 0x429   : > { %v933_v24 = vpop.f32.mrb[2].mxu0 }
 0x42a   : > { %938 = vrot.lane.b32.xlu1 %v933_v24, %s5024_s29  ;;  %v4434_v26 = vpop.f32.mrb[3].mxu0 }
 0x42d   : > { %v1121_v27 = vpop.f32.mrb[4].mxu0 }
 0x42e   : > { %853 = vperm.xlu1 %4823, %v5241_v33   ;;  %1126 = vrot.lane.b32.xlu0 %v1121_v27, %s5028_s30  ;;  %v4444_v28 = vpop.f32.mrb[5].mxu0 }
 0x42f   : > { %v5604_v28 = vpop.permute.xlu1 %1787 }
 0x431   : > { %v5565_v30 = vpop.f32.mrb[6].mxu1 }
 0x432   : > { %4825 = vset.pattern.permute.xlu1 %v5029_v31  ;;  %3568 = vperm.xlu0 %4822, %v5241_v33   ;;  %v4449_v32 = vpop.f32.mrb[7].mxu1 }
 0x433   : > { %3756 = vperm.xlu1 %4825, %v5241_v33  }
 0x436   : > { %4824 = vset.pattern.permute.xlu0 %v5030_v35  ;;  %v1308_v36 = vpop.f32.mrb[6].mxu0 }
 0x437   : > { %4826 = vset.pattern.permute.xlu1 %v5031_v37  ;;  %3662 = vperm.xlu0 %4824, %v5241_v33   ;;  %v4454_v38 = vpop.f32.mrb[7].mxu0  ;;  %v5607_v37 = vpop.permute.xlu1 %2162 }
 0x438   : > { %1228 = vperm.xlu1 %4826, %v5241_v33  }
 0x43b   : > { %4827 = vset.pattern.permute.xlu0 %v5032_v39  ;;  %v1402_v40 = vpop.f32.mrb[8].mxu1 }
 0x43c   : > { %4828 = vset.pattern.permute.xlu1 %v5033_v41  ;;  %1603 = vperm.xlu0 %4827, %v5241_v33   ;;  %v4459_v42 = vpop.f32.mrb[9].mxu1 }
 0x43d   : > { %1978 = vperm.xlu1 %4828, %v5241_v33  }
 0x440   : > { %v1496_v43 = vpop.f32.mrb[8].mxu0  ;;  %4833 = vset.pattern.permute.xlu0 %v5029_v31 }
 0x441   : > { %4829 = vset.pattern.permute.xlu1 %v5034_v44  ;;  %v4464_v45 = vpop.f32.mrb[9].mxu0 }
 0x442   : > { %2353 = vperm.xlu1 %4829, %v5241_v33  }
 0x445   : > { %v5574_v46 = vpop.f32.mrb[10].mxu1 }
 0x446   : > { %4830 = vset.pattern.permute.xlu1 %v5035_v47  ;;  %v4469_v48 = vpop.f32.mrb[11].mxu1 }
 0x447   : > { %2728 = vperm.xlu1 %4830, %v5241_v33  }
 0x44a   : > { %v1683_v49 = vpop.f32.mrb[10].mxu0 }
 0x44b   : > { %1313 = vrot.lane.b32.xlu1 %v1308_v36, %s5024_s29  ;;  %v4474_v50 = vpop.f32.mrb[11].mxu0 }
 0x44c   : > { %4831 = vset.pattern.permute.xlu1 %v5036_v13 }
 0x44f   : > { %1407 = vrot.lane.b32.xlu1 %v1402_v40, %s5005_s27  ;;  %v1777_v51 = vpop.f32.mrb[12].mxu1  ;;  %v5612_v40 = vpop.permute.xlu1 %2537 }
 0x450   : > { %v4479_v52 = vpop.f32.mrb[13].mxu1 }
 0x451   : > { %v5621_v52 = vpop.permute.xlu0 %3381 }
 0x453   : > { %1501 = vrot.lane.b32.xlu1 %v1496_v43, %s5028_s30  ;;  %v5616_v47 = vpop.permute.xlu1 %2912 }
 0x454   : > { %v1871_v53 = vpop.f32.mrb[12].mxu0 }
 0x455   : > { %v4484_v54 = vpop.f32.mrb[13].mxu0 }
 0x457   : > { %1688 = vrot.lane.b32.xlu1 %v1683_v49, %s5024_s29  ;;  %v5623_v54 = vpop.permute.xlu1 %3006 }
 0x459   : > { %v5581_v55 = vpop.f32.mrb[14].mxu1 }
 0x45a   : > { %v4489_v56 = vpop.f32.mrb[15].mxu1 }
 0x45b   : > { %1782 = vrot.lane.b32.xlu1 %v1777_v51, %s5005_s27 }
 0x45e   : > { %v2058_v57 = vpop.f32.mrb[14].mxu0 }
 0x45f   : > { %1876 = vrot.lane.b32.xlu1 %v1871_v53, %s5028_s30  ;;  %v4494_v58 = vpop.f32.mrb[15].mxu0  ;;  %v2152_v59 = vpop.f32.mrb[16].mxu1 }
 0x460   : > { %v4499_v61 = vpop.f32.mrb[17].mxu1 }
 0x461   : > { %v4283_v61 = vld [vmem:[#allocation2] ss:$0 sm:$0xff] }
 0x463   : > { %2063 = vrot.lane.b32.xlu1 %v2058_v57, %s5024_s29  ;;  %v2246_v62 = vpop.f32.mrb[16].mxu0 }
 0x464   : > { %v4504_v63 = vpop.f32.mrb[17].mxu0 }
 0x467   : > { %v2433_v1 = vpop.f32.mrb[18].mxu0  ;;  %2157 = vrot.lane.b32.xlu1 %v2152_v59, %s5005_s27  ;;  %v5629_v59 = vpop.permute.xlu1 %3287 }
 0x468   : > { %v4514_v2 = vpop.f32.mrb[19].mxu0  ;;  %v5591_v3 = vpop.f32.mrb[18].mxu1 }
 0x469   : > { %v4509_v4 = vpop.f32.mrb[19].mxu1 }
 0x46b   : > { %2251 = vrot.lane.b32.xlu1 %v2246_v62, %s5028_s30 }
 0x46d   : > { %v2527_v6 = vpop.f32.mrb[20].mxu1 }
 0x46e   : > { %v4519_v7 = vpop.f32.mrb[21].mxu1 }
 0x46f   : > { %2438 = vrot.lane.b32.xlu1 %v2433_v1, %s5024_s29  ;;  %v851_v7 = vadd.f32 %v4283_v61, %v5559_v20 }
 0x472   : > { %v2621_v21 = vpop.f32.mrb[20].mxu0 }
 0x473   : > { %v4524_v22 = vpop.f32.mrb[21].mxu0  ;;  %2532 = vrot.lane.b32.xlu1 %v2527_v6, %s5005_s27  ;;  %v5600_v23 = vpop.f32.mrb[22].mxu1 }
 0x474   : > { %v4529_v24 = vpop.f32.mrb[23].mxu1 }
 0x477   : > { %v2808_v26 = vpop.f32.mrb[22].mxu0  ;;  %2626 = vrot.lane.b32.xlu1 %v2621_v21, %s5028_s30  ;;  %v5626_v56 = vpop.permute.xlu0 %756 }
 0x478   : > { %2813 = vrot.lane.b32.xlu0 %v2808_v26, %s5024_s29  ;;  %v4534_v27 = vpop.f32.mrb[23].mxu0 }
 0x47c   : > { %v2902_v31 = vpop.f32.mrb[24].mxu1 }
 0x47d   : > { %2907 = vrot.lane.b32.xlu1 %v2902_v31, %s5005_s27  ;;  %v2996_v32 = vpop.f32.mrb[24].mxu0  ;;  %v4539_v35 = vpop.f32.mrb[25].mxu1 }
 0x47e   : > { %v4544_v36 = vpop.f32.mrb[25].mxu0 }
 0x47f   : > { %v4288_v36 = vld [vmem:[#allocation2 + $0x1] ss:$0 sm:$0xff] }
 0x481   : > { %3001 = vrot.lane.b32.xlu1 %v2996_v32, %s5028_s30  ;;  %v5610_v38 = vpop.f32.mrb[26].mxu1 }
 0x482   : > { %v4549_v39 = vpop.f32.mrb[27].mxu1 }
 0x483   : > { %v1226_v39 = vadd.f32 %v4288_v36, %v5565_v30 }
 0x485   : > { %v3277_v41 = vpop.f32.mrb[28].mxu1 }
 0x486   : > { %v3183_v42 = vpop.f32.mrb[26].mxu0  ;;  %v4559_v43 = vpop.f32.mrb[29].mxu1 }
 0x487   : > { %3188 = vrot.lane.b32.xlu1 %v3183_v42, %s5024_s29  ;;  %v4554_v44 = vpop.f32.mrb[27].mxu0  ;;  %v4298_v43 = vld [vmem:[#allocation2 + $0x3] ss:$0 sm:$0xff] }
 0x48b   : > { %3282 = vrot.lane.b32.xlu1 %v3277_v41, %s5005_s27  ;;  %v3371_v45 = vpop.f32.mrb[28].mxu0 }
 0x48c   : > { %v4564_v48 = vpop.f32.mrb[29].mxu0 }
 0x48d   : > { %v1976_v48 = vadd.f32 %v4298_v43, %v5581_v55 }
 0x48f   : > { %3376 = vrot.lane.b32.xlu1 %v3371_v45, %s5028_s30  ;;  %v3558_v49 = vpop.f32.mrb[30].mxu0 }
 0x490   : > { %v5619_v50 = vpop.f32.mrb[30].mxu1  ;;  %v4574_v51 = vpop.f32.mrb[31].mxu0 }
 0x491   : > { %v4569_v53 = vpop.f32.mrb[31].mxu1 }
 0x493   : > { %3563 = vrot.lane.b32.xlu1 %v3558_v49, %s5024_s29 }
 0x495   : > { %v3652_v57 = vpop.f32.mrb[32].mxu1 }
 0x496   : > { %3657 = vrot.lane.b32.xlu0 %v3652_v57, %s5005_s27  ;;  %v4579_v58 = vpop.f32.mrb[33].mxu1  ;;  %v5661_v57 = vld [vmem:[#allocation2 + $0x4] ss:$0 sm:$0xff] }
 0x497   : > { %v5667_v30 = vadd.f32 %v5661_v57, %v5591_v3 }
 0x499   : > { %v1033_v62 = vpop.permute.xlu0 %1032 }
 0x49a   : > { %v1035_v63 = vadd.f32 %v4283_v61, %v1033_v62  ;;  %v3746_v1 = vpop.f32.mrb[32].mxu0  ;;  %v5669_v62 = vld [vmem:[#allocation2 + $0x5] ss:$0 sm:$0xff] }
 0x49b   : > { %3751 = vrot.lane.b32.xlu0 %v3746_v1, %s5028_s30  ;;  %v4584_v2 = vpop.f32.mrb[33].mxu0 }
 0x49c   : > { %v1040_v4 = vmul.f32 %v5537_v8, %v1035_v63  ;;  %v939_v6 = vpop.permute.xlu1 %938 }
 0x49d   : > { %v941_v13 = vadd.f32 %v4283_v61, %v939_v6 }
 0x49f   : > { %v946_v21 = vmul.f32 %v5585_v60, %v941_v13  ;;  %v3765_v22 = vsel %vm759_vm7, %v851_v7, %v941_v13  ;;  %1042 = vrot.lane.b32.xlu0 %v1040_v4, %s5005_s27 }
 0x4a0   : > { %v1127_v24 = vpop.permute.xlu0 %1126  ;;  %v3767_v27 = vsel %vm3766_vm8, %v3765_v22, %v1035_v63 }
 0x4a1   : > { %v1129_v26 = vadd.f32 %v4283_v61, %v1127_v24  ;;  %948 = vrot.lane.b32.xlu1 %v946_v21, %s5028_s30 }
 0x4a3   : > { %v1134_v8 = vmul.f32 %v5588_v0, %v1129_v26  ;;  %v5641_v31 = vsel %vm3768_vm9, %v3767_v27, %v1129_v26  ;;  %v4293_v0 = vld [vmem:[#allocation2 + $0x2] ss:$0 sm:$0xff] }
 0x4a4   : > { %3791 = vst [vmem:[%s5202_s14] sm:$0xff] %v5641_v31  ;;  %v1601_v45 = vadd.f32 %v4293_v0, %v5574_v46  ;;  %v5676_v46 = vadd.f32 %v5669_v62, %v5600_v23 }
 0x4a5   : > { %1136 = vrot.lane.b32.xlu1 %v1134_v8, %s5024_s29 }
 0x4ad   : > { %v854_v20 = vpop.permute.xlu1 %853 }
 0x4ae   : > { %v5646_v60 = vmul.f32 %v854_v20, %v851_v7 }
 0x4b1   : > { %v5648_v32 = vpop.permute.xlu0 %3568 }
 0x4b2   : > { %v5650_v35 = vpop.permute.xlu1 %3756 }
 0x4b6   : > { %v5653_v41 = vpop.permute.xlu0 %3662 }
 0x4b7   : > { %v1229_v42 = vpop.permute.xlu1 %1228 }
 0x4b8   : > { %v5655_v44 = vmul.f32 %v1229_v42, %v1226_v39 }
 0x4bb   : > { %v1604_v49 = vpop.permute.xlu0 %1603 }
 0x4bc   : > { %v5659_v51 = vmul.f32 %v1604_v49, %v1601_v45  ;;  %v1979_v53 = vpop.permute.xlu1 %1978 }
 0x4bd   : > { %v5663_v58 = vmul.f32 %v1979_v53, %v1976_v48 }
 0x4c1   : > { %v2354_v61 = vpop.permute.xlu1 %2353 }
 0x4c2   : > { %v5672_v63 = vmul.f32 %v2354_v61, %v5667_v30 }
 0x4c6   : > { %v2729_v55 = vpop.permute.xlu1 %2728 }
 0x4c7   : > { %v5679_v1 = vmul.f32 %v2729_v55, %v5676_v46 }
 0x4ca   : > { %v1314_v2 = vpop.permute.xlu1 %1313 }
 0x4cb   : > { %v1316_v4 = vadd.f32 %v4288_v36, %v1314_v2 }
 0x4cd   : > { %v1321_v3 = vmul.f32 %v5594_v5, %v1316_v4  ;;  %v3770_v22 = vsel %vm759_vm7, %v1226_v39, %v1316_v4  ;;  %v5037_v4 = vmov 1966171168  }
 0x4ce   : > { %v1408_v6 = vpop.permute.xlu1 %1407 }
 0x4cf   : > { %v1410_v7 = vadd.f32 %v4288_v36, %v1408_v6  ;;  %1323 = vrot.lane.b32.xlu1 %v1321_v3, %s5028_s30 }
 0x4d1   : > { %v1415_v13 = vmul.f32 %v5597_v19, %v1410_v7  ;;  %v3771_v24 = vsel %vm3766_vm8, %v3770_v22, %v1410_v7 }
 0x4d2   : > { %v1502_v21 = vpop.permute.xlu1 %1501 }
 0x4d3   : > { %v1504_v23 = vadd.f32 %v4288_v36, %v1502_v21  ;;  %1417 = vrot.lane.b32.xlu1 %v1415_v13, %s5005_s27 }
 0x4d5   : > { %v1509_v26 = vmul.f32 %v5539_v9, %v1504_v23  ;;  %v3772_v27 = vsel %vm3768_vm9, %v3771_v24, %v1504_v23 }
 0x4d6   : > { %3792 = vst [vmem:[%s5202_s14 + $0x8] sm:$0xff] %v3772_v27  ;;  %v3807_v5 = vcombine.high %v5641_v31, %v3772_v27  ;;  %v1689_v8 = vpop.permute.xlu1 %1688 }
 0x4d7   : > { %v1691_v20 = vadd.f32 %v4293_v0, %v1689_v8  ;;  %1511 = vrot.lane.b32.xlu0 %v1509_v26, %s5024_s29 }
 0x4d9   : > { %v1696_v19 = vmul.f32 %v5541_v10, %v1691_v20  ;;  %v3773_v9 = vsel %vm759_vm7, %v1601_v45, %v1691_v20 }
 0x4da   : > { %v1783_v39 = vpop.permute.xlu1 %1782 }
 0x4db   : > { %v1785_v36 = vadd.f32 %v4293_v0, %v1783_v39  ;;  %1698 = vrot.lane.b32.xlu0 %v1696_v19, %s5028_s30  ;;  %v5038_v19 = vmov 60  }
 0x4dd   : > { %v1790_v42 = vmul.f32 %v5604_v28, %v1785_v36  ;;  %v3774_v31 = vsel %vm3766_vm8, %v3773_v9, %v1785_v36  ;;  %v3812_v28 = vunpack.c.l.s4 %v5037_v4 }
 0x4de   : > { %v1877_v49 = vpop.permute.xlu1 %1876 }
 0x4df   : > { %v1879_v53 = vadd.f32 %v4293_v0, %v1877_v49  ;;  %1792 = vrot.lane.b32.xlu1 %v1790_v42, %s5005_s27  ;;  %v3813_v6 = vunpack.c.0.s8 %v3812_v28 }
 0x4e1   : > { %v1884_v61 = vmul.f32 %v5543_v12, %v1879_v53  ;;  %v3775_v55 = vsel %vm3768_vm9, %v3774_v31, %v1879_v53  ;;  %v5708_v22 = vsub.s32 %v3813_v6, %v5236_v29 }
 0x4e2   : > { %3793 = vst [vmem:[%s5202_s14 + $0x10] sm:$0xff] %v3775_v55  ;;  %v2064_v10 = vpop.permute.xlu1 %2063 }
 0x4e3   : > { %v2066_v2 = vadd.f32 %v4298_v43, %v2064_v10  ;;  %1886 = vrot.lane.b32.xlu0 %v1884_v61, %s5024_s29 }
 0x4e5   : > { %v2071_v3 = vmul.f32 %v5545_v14, %v2066_v2  ;;  %v3776_v13 = vsel %vm759_vm7, %v1976_v48, %v2066_v2 }
 0x4e6   : > { %v2158_v45 = vpop.permute.xlu1 %2157 }
 0x4e7   : > { %v2160_v0 = vadd.f32 %v4298_v43, %v2158_v45  ;;  %2073 = vrot.lane.b32.xlu0 %v2071_v3, %s5028_s30 }
 0x4e9   : > { %v2165_v7 = vmul.f32 %v5607_v37, %v2160_v0  ;;  %v3777_v23 = vsel %vm3766_vm8, %v3776_v13, %v2160_v0 }
 0x4ea   : > { %v2252_v12 = vpop.permute.xlu1 %2251  ;;  %v2814_v36 = vpop.permute.xlu0 %2813 }
 0x4eb   : > { %v2254_v21 = vadd.f32 %v4298_v43, %v2252_v12  ;;  %2167 = vrot.lane.b32.xlu1 %v2165_v7, %s5005_s27  ;;  %v5718_v43 = vrot.slane %v3807_v5, %v5708_v22 }
 0x4ed   : > { %v2259_v14 = vmul.f32 %v5547_v15, %v2254_v21  ;;  %v3778_v24 = vsel %vm3768_vm9, %v3777_v23, %v2254_v21  ;;  %v4318_v21 = vld [vmem:[#allocation2 + $0x7] ss:$0 sm:$0xff] }
 0x4ee   : > { %3794 = vst [vmem:[%s5202_s14 + $0x18] sm:$0xff] %v3778_v24  ;;  %v3808_v26 = vcombine.high %v3775_v55, %v3778_v24  ;;  %v2439_v27 = vpop.permute.xlu1 %2438 }
 0x4ef   : > { %v2441_v37 = vadd.f32 %v5661_v57, %v2439_v27  ;;  %3103 = vperm.xlu1 %4831, %v5241_v33   ;;  %2261 = vrot.lane.b32.xlu0 %v2259_v14, %s5024_s29 }
 0x4f0   : > { %v5721_v29 = vrot.slane %v3808_v26, %v5708_v22 }
 0x4f1   : > { %v2446_v48 = vmul.f32 %v5549_v16, %v2441_v37  ;;  %v3779_v16 = vsel %vm759_vm7, %v5667_v30, %v2441_v37  ;;  %v760_v37 = vsel %vm759_vm7, %v5626_v56, 0.0 }
 0x4f2   : > { %v3839_v15 = vcombine.high %v5718_v43, %v5721_v29  ;;  %v2533_v8 = vpop.permute.xlu1 %2532  ;;  %v3865_v43 = vld [vmem:[%s5985_s22 + $0x10] sm:$0xff] }
 0x4f3   : > { %v2535_v20 = vadd.f32 %v5661_v57, %v2533_v8  ;;  %4832 = vset.pattern.permute.xlu1 %v5038_v19  ;;  %2448 = vrot.lane.b32.xlu0 %v2446_v48, %s5028_s30 }
 0x4f4   : > { %3478 = vperm.xlu1 %4832, %v5241_v33   ;;  %v2816_v33 = vadd.f32 %v5669_v62, %v2814_v36 }
 0x4f5   : > { %v2540_v5 = vmul.f32 %v5612_v40, %v2535_v20  ;;  %v3780_v49 = vsel %vm3766_vm8, %v3779_v16, %v2535_v20 }
 0x4f6   : > { %v2627_v39 = vpop.permute.xlu1 %2626  ;;  %v2821_v30 = vmul.f32 %v5553_v17, %v2816_v33  ;;  %v3782_v61 = vsel %vm759_vm7, %v5676_v46, %v2816_v33  ;;  %v4313_v17 = vld [vmem:[#allocation2 + $0x6] ss:$0 sm:$0xff] }
 0x4f7   : > { %v2629_v42 = vadd.f32 %v5661_v57, %v2627_v39  ;;  %v5754_v6 = vadd.f32 %v4313_v17, %v5610_v38 }
 0x4f8   : > { %2542 = vrot.lane.b32.xlu1 %v2540_v5, %s5005_s27 }
 0x4f9   : > { %v2634_v9 = vmul.f32 %v5551_v34, %v2629_v42  ;;  %v3781_v53 = vsel %vm3768_vm9, %v3780_v49, %v2629_v42 }
 0x4fa   : > { %3795 = vst [vmem:[%s5202_s14 + $0x20] sm:$0xff] %v3781_v53  ;;  %v2908_v40 = vpop.permute.xlu1 %2907 }
 0x4fb   : > { %v2910_v31 = vadd.f32 %v5669_v62, %v2908_v40 }
 0x4fc   : > { %2636 = vrot.lane.b32.xlu1 %v2634_v9, %s5024_s29 }
 0x4fd   : > { %v3783_v34 = vsel %vm3766_vm8, %v3782_v61, %v2910_v31  ;;  %v2915_v2 = vmul.f32 %v5616_v47, %v2910_v31 }
 0x4fe   : > { %v3002_v57 = vpop.permute.xlu1 %3001 }
 0x4ff   : > { %v3004_v55 = vadd.f32 %v5669_v62, %v3002_v57 }
 0x500   : > { %2823 = vrot.lane.b32.xlu1 %v2821_v30, %s5028_s30  ;;  %v4278_v30 = vld [vmem:[%s5935_s4] ss:$0 sm:$0xff] }
 0x501   : > { %v3784_v10 = vsel %vm3768_vm9, %v3783_v34, %v3004_v55  ;;  %v3009_v3 = vmul.f32 %v5623_v54, %v3004_v55 }
 0x502   : > { %3796 = vst [vmem:[%s5202_s14 + $0x28] sm:$0xff] %v3784_v10  ;;  %v3809_v4 = vcombine.high %v3781_v53, %v3784_v10  ;;  %v3189_v28 = vpop.permute.xlu1 %3188 }
 0x503   : > { %v3191_v46 = vadd.f32 %v4313_v17, %v3189_v28 }
 0x504   : > { %2917 = vrot.lane.b32.xlu1 %v2915_v2, %s5005_s27  ;;  %v3831_v56 = vrot.slane %v3809_v4, %v5708_v22 }
 0x505   : > { %v3196_v47 = vmul.f32 %v5555_v18, %v3191_v46  ;;  %v3785_v12 = vsel %vm759_vm7, %v5754_v6, %v3191_v46  ;;  %v5765_v18 = vadd.f32 %v4318_v21, %v5619_v50 }
 0x506   : > { %v3283_v45 = vpop.permute.xlu1 %3282 }
 0x507   : > { %v3285_v62 = vadd.f32 %v4313_v17, %v3283_v45 }
 0x508   : > { %v3658_v0 = vpop.permute.xlu0 %3657  ;;  %3011 = vrot.lane.b32.xlu1 %v3009_v3, %s5024_s29 }
 0x509   : > { %v3786_v54 = vsel %vm3766_vm8, %v3785_v12, %v3285_v62  ;;  %v3290_v14 = vmul.f32 %v5629_v59, %v3285_v62  ;;  %v3660_v27 = vadd.f32 %v4318_v21, %v3658_v0 }
 0x50a   : > { %v3377_v7 = vpop.permute.xlu1 %3376 }
 0x50b   : > { %v3379_v13 = vadd.f32 %v4313_v17, %v3377_v7 }
 0x50c   : > { %3198 = vrot.lane.b32.xlu1 %v3196_v47, %s5028_s30 }
 0x50d   : > { %v3787_v23 = vsel %vm3768_vm9, %v3786_v54, %v3379_v13  ;;  %v3752_v38 = vpop.permute.xlu0 %3751  ;;  %v3384_v57 = vmul.f32 %v5621_v52, %v3379_v13  ;;  %v3866_v52 = vld [vmem:[%s5985_s22 + $0x18] sm:$0xff] }
 0x50e   : > { %3797 = vst [vmem:[%s5202_s14 + $0x30] sm:$0xff] %v3787_v23  ;;  %v3564_v24 = vpop.permute.xlu1 %3563  ;;  %v3754_v48 = vadd.f32 %v4318_v21, %v3752_v38  ;;  %v4614_v29 = vpack.c.bf16 %v3866_v52, %v3865_v43 }
 0x50f   : > { %v3566_v26 = vadd.f32 %v4318_v21, %v3564_v24 }
 0x510   : > { %3292 = vrot.lane.b32.xlu1 %v3290_v14, %s5005_s27  ;;  %v3759_v33 = vmul.f32 %v5650_v35, %v3754_v48  ;;  %v3863_v35 = vld [vmem:[%s5985_s22] sm:$0xff] }
 0x511   : > { %v3571_v8 = vmul.f32 %v5648_v32, %v3566_v26  ;;  %v3788_v59 = vsel %vm759_vm7, %v5765_v18, %v3566_v26  ;;  %v1043_v36 = vpop.permute.xlu0 %1042  ;;  %v3665_v32 = vmul.f32 %v5653_v41, %v3660_v27 }
 0x512   : > { %v3789_v20 = vsel %vm3766_vm8, %v3788_v59, %v3660_v27  ;;  %761 = vadd.xlane.f32.xlu0 %v760_v37 }
 0x513   : > { %v3790_v19 = vsel %vm3768_vm9, %v3789_v20, %v3754_v48  ;;  %v949_v50 = vpop.permute.xlu1 %948 }
 0x514   : > { %3798 = vst [vmem:[%s5202_s14 + $0x38] sm:$0xff] %v3790_v19  ;;  %v3810_v5 = vcombine.high %v3787_v23, %v3790_v19  ;;  %v951_v39 = vadd.f32 %v949_v50, %v5646_v60  ;;  %3573 = vrot.lane.b32.xlu1 %v3571_v8, %s5028_s30  ;;  %v3847_v60 = vrot.slane %v3839_v15, %v5708_v22  ;;  %s5837_s14 = sadd.s32 %s4950_s28, %s4328_s24  ;;  %s4844_s28 = sshll.u32 %s5039_s26, 4  ;;  %s4845_s28 = int_to_ptr.vmem [resolvable:$false] %s4844_s28 }
 0x515   : > { %s4329_s5 = sshll.u32 %s5837_s14, 7  ;;  %p4847_p5 = scmp.lt.s32.totalorder %s4088_s25, %s4845_s28 }
 0x516   : > { %v3838_v16 = vrot.slane %v3810_v5, %v5708_v22  ;;  %v1045_v42 = vadd.f32 %v1043_v36, %v951_v39  ;;  %v3949_v36 = vld [vmem:[%s5986_s11 + $0x8] sm:$0xff]  ;;  %s5845_s13 = scalar_lea.hbm %s5991_s8, %s4329_s5 }
 0x517   : > { %v1137_v49 = vpop.permute.xlu1 %1136 }
 0x518   : > { %v3840_v9 = vcombine.high %v3831_v56, %v3838_v16  ;;  %v1139_v53 = vadd.f32 %v1137_v49, %v1045_v42  ;;  %3667 = vrot.lane.b32.xlu1 %v3665_v32, %s5005_s27  ;;  %s4054_s27 = scalar_lea.sflag [#allocation7], %s5988_s18 }
 0x51a   : > { %v3854_v40 = vrot.slane %v3840_v9, %v5708_v22  ;;  %v1232_v31 = vadd.f32 %v5655_v44, %v1139_v53  ;;  %v3864_v44 = vld [vmem:[%s5985_s22 + $0x8] sm:$0xff] }
 0x51b   : > { %v4611_v22 = vpack.c.bf16 %v3864_v44, %v3863_v35 }
 0x51c   : > { %v3855_v41 = vcombine.high %v3847_v60, %v3854_v40  ;;  %3761 = vrot.lane.b32.xlu1 %v3759_v33, %s5024_s29 }
 0x51d   : > { %4612 = vmatpush3.bf16.msra.mxu1 %v4611_v22 }
 0x51e   : > { %3857 = vst [vmem:[#allocation2] sm:$0xff] %v3855_v41  ;;  %4613 = vmatprep.subr.bf16.mxu1 %v4968_v11 }
 0x520   : > { %657 = vrot.lane.b32.xlu1 %v4278_v30, %s5028_s30  ;;  %s4840_s30 = scalar_lea.vmem %s4088_s25, 128 }
 0x521   : > { %4615 = vmatpush3.bf16.msra.mxu1 %v4614_v29  ;;  %p4841_p1 = scmp.ne.s32.totalorder %s4088_s25, %s4840_s30 }
 0x523   : > { %p4842_p2 = pnand %p4841_p1, %p5162_p3 }
 0x525   : > { %p4843_p4 = pneg %p4842_p2 }
 0x528   : > { %3386 = vrot.lane.b32.xlu0 %v3384_v57, %s5024_s29 }
 0x541   : > { %v1324_v15 = vpop.permute.xlu1 %1323 }
 0x542   : > { %v1326_v55 = vadd.f32 %v1324_v15, %v1232_v31  ;;  %v4322_v15 = vld [vmem:[%s5989_s17] ss:$0 sm:$0xff] }
 0x545   : > { %v1418_v61 = vpop.permute.xlu1 %1417 }
 0x546   : > { %v1420_v34 = vadd.f32 %v1418_v61, %v1326_v55 }
 0x549   : > { %v1512_v10 = vpop.permute.xlu0 %1511 }
 0x54a   : > { %v1514_v2 = vadd.f32 %v1512_v10, %v1420_v34 }
 0x54c   : > { %v1607_v4 = vadd.f32 %v5659_v51, %v1514_v2 }
 0x54d   : > { %v1699_v28 = vpop.permute.xlu0 %1698 }
 0x54e   : > { %v1701_v3 = vadd.f32 %v1699_v28, %v1607_v4 }
 0x551   : > { %v1793_v17 = vpop.permute.xlu1 %1792 }
 0x552   : > { %v1795_v46 = vadd.f32 %v1793_v17, %v1701_v3 }
 0x555   : > { %v1887_v45 = vpop.permute.xlu0 %1886 }
 0x556   : > { %v1889_v62 = vadd.f32 %v1887_v45, %v1795_v46 }
 0x558   : > { %v1982_v0 = vadd.f32 %v5663_v58, %v1889_v62 }
 0x559   : > { %v2074_v47 = vpop.permute.xlu0 %2073 }
 0x55a   : > { %v2076_v12 = vadd.f32 %v2074_v47, %v1982_v0 }
 0x55d   : > { %v2168_v7 = vpop.permute.xlu1 %2167 }
 0x55e   : > { %v2170_v13 = vadd.f32 %v2168_v7, %v2076_v12 }
 0x561   : > { %v2262_v21 = vpop.permute.xlu0 %2261 }
 0x562   : > { %v2264_v54 = vadd.f32 %v2262_v21, %v2170_v13 }
 0x564   : > { %v2357_v23 = vadd.f32 %v5672_v63, %v2264_v54  ;;  %v3948_v63 = vld [vmem:[%s5986_s11] sm:$0xff] }
 0x565   : > { %v2449_v24 = vpop.permute.xlu0 %2448  ;;  %v4617_v56 = vpack.c.bf16 %v3949_v36, %v3948_v63 }
 0x566   : > { %v2451_v26 = vadd.f32 %v2449_v24, %v2357_v23 }
 0x567   : > { %4618 = vmatpush3.bf16.msra.mxu0 %v4617_v56 }
 0x568   : > { %4619 = vmatprep.subr.bf16.mxu0 %v4968_v11 }
 0x56e   : > { %v3104_v14 = vpop.permute.xlu1 %3103 }
 0x56f   : > { %v3106_v42 = vmul.f32 %v3104_v14, %v5754_v6 }
 0x573   : > { %v3479_v38 = vpop.permute.xlu1 %3478 }
 0x574   : > { %v3481_v57 = vmul.f32 %v3479_v38, %v5765_v18  ;;  %v3951_v18 = vld [vmem:[%s5986_s11 + $0x18] sm:$0xff] }
 0x577   : > { %v2543_v51 = vpop.permute.xlu1 %2542 }
 0x578   : > { %v2545_v27 = vadd.f32 %v2543_v51, %v2451_v26 }
 0x57b   : > { %v2637_v37 = vpop.permute.xlu1 %2636 }
 0x57c   : > { %v2639_v48 = vadd.f32 %v2637_v37, %v2545_v27 }
 0x57e   : > { %v2732_v8 = vadd.f32 %v5679_v1, %v2639_v48 }
 0x57f   : > { %v2824_v59 = vpop.permute.xlu1 %2823 }
 0x580   : > { %v2826_v39 = vadd.f32 %v2824_v59, %v2732_v8 }
 0x583   : > { %v2918_v58 = vpop.permute.xlu1 %2917 }
 0x584   : > { %v2920_v32 = vadd.f32 %v2918_v58, %v2826_v39 }
 0x587   : > { %v3012_v20 = vpop.permute.xlu1 %3011 }
 0x588   : > { %v3014_v1 = vadd.f32 %v3012_v20, %v2920_v32 }
 0x58a   : > { %v3107_v9 = vadd.f32 %v3106_v42, %v3014_v1 }
 0x58b   : > { %v3199_v19 = vpop.permute.xlu1 %3198 }
 0x58c   : > { %v3201_v33 = vadd.f32 %v3199_v19, %v3107_v9 }
 0x58f   : > { %v3293_v50 = vpop.permute.xlu1 %3292 }
 0x590   : > { %v3295_v41 = vadd.f32 %v3293_v50, %v3201_v33 }
 0x593   : > { %v3574_v5 = vpop.permute.xlu1 %3573 }
 0x597   : > { %v3668_v16 = vpop.permute.xlu1 %3667 }
 0x59b   : > { %v3762_v49 = vpop.permute.xlu1 %3761 }
 0x59f   : > { %v658_v53 = vpop.permute.xlu1 %657  ;;  %v762_v60 = vpop.xlane.xlu0 %761 }
 0x5a0   : > { %v660_v40 = vadd.f32 %v658_v53, %v5233_v25  ;;  %v763_v31 = vadd.f32 1e-05, %v762_v60  ;;  %v3950_v25 = vld [vmem:[%s5986_s11 + $0x10] sm:$0xff] }
 0x5a1   : > { %v4620_v29 = vpack.c.bf16 %v3951_v18, %v3950_v25 }
 0x5a2   : > { %4838 = vrcp.f32 %v763_v31  ;;  %4034 = vrot.lane.b32.xlu1 %v660_v40, %s5024_s29  ;;  %s4846_s29 = scalar_lea.vmem %s4845_s28, 256 }
 0x5a3   : > { %v3387_v30 = vpop.permute.xlu0 %3386  ;;  %4621 = vmatpush3.bf16.msra.mxu0 %v4620_v29  ;;  %p4848_p6 = scmp.lt.s32.totalorder %s4846_s29, %s4840_s30 }
 0x5a4   : > { %v3389_v35 = vadd.f32 %v3387_v30, %v3295_v41 }
 0x5a5   : > { %p4849_p7 = por %p4848_p6, %p4847_p5 }
 0x5a6   : > { %v3482_v44 = vadd.f32 %v3481_v57, %v3389_v35 }
 0x5a7   : > { %p4850_p9 = pnand %p4849_p7, %p4843_p4 }
 0x5a8   : > { %v3576_v11 = vadd.f32 %v3574_v5, %v3482_v44 }
 0x5aa   : > { %v3670_v6 = vadd.f32 %v3668_v16, %v3576_v11 }
 0x5ac   : > { %v4839_v22 = vpop.eup %4838  ;;  %v3764_v43 = vadd.f32 %v3762_v49, %v3670_v6 }
 0x5ae   : > { %v3862_v52 = vmul.f32 %v4839_v22, %v3764_v43 }
 0x5b0   : > { %4594 = vmatmul.mubr.msk.f32.vlgmr.msra.gmra.mrb[34].mxu1 %vm759_vm7, %v3862_v52 }
 0x683   : > { %v3943_v61 = vpop.f32.mrb[34].mxu1 }
 0x684   : > { %v3944_v55 = vadd.f32 %v4322_v15, %v3943_v61  ;;  %v4595_v34 = vpop.f32.mrb[35].mxu1 }
 0x686   : > { %v3947_v10 = vmax.f32 %v3944_v55, 0.0 }
 0x688   : > { %4605 = vmatmul.mubr.msk.f32.vlgmr.msra.gmra.mrb[34].mxu0 %vm759_vm7, %v3947_v10 }
 0x689   : > { %4853 = shalt.err (!%p4850_p9)
}
 0x68a   : > { %s4854_s20 = scalar_lea.hbm %s5845_s13, 128  ;;  %s4858_s21 = scalar_lea.hbm %s5991_s8, 512 }
 0x68b   : > { %p4855_p10 = scmp.ne.s32.totalorder %s5845_s13, %s4854_s20  ;;  %p4859_p13 = scmp.lt.u32.totalorder %s5845_s13, %s5991_s8 }
 0x68c   : > { %p4860_p0 = scmp.lt.u32.totalorder %s4858_s21, %s4854_s20  ;;  %p4862_p2 = scmp.lt.u32.totalorder %s4854_s20, %s5845_s13 }
 0x68d   : > { %p4856_p11 = pnand %p4855_p10, %p5162_p3 }
 0x68e   : > { %p4861_p1 = por %p4860_p0, %p4859_p13 }
 0x68f   : > { %p4857_p12 = pneg %p4856_p11 }
 0x690   : > { %p4863_p4 = por %p4862_p2, %p4861_p1 }
 0x692   : > { %p4864_p5 = pnand %p4863_p4, %p4857_p12 }
 0x694   : > { %4867 = shalt.err (!%p4864_p5)
}
 0x695   : > { %4623 = dma.vmem_to_hbm [thread:$0]  (%p5162_p3), %s4088_s25, 128, %s5845_s13, %s4054_s27   ;;  %v4035_v46 = vpop.permute.xlu1 %4034 }
 0x696   : > { %s5992_s30 = sld [smem:[#allocation26_spill]]  ;;  %s4069_s26 = sshll.u32 %s5204_s16, 4  ;;  %s5877_s26 = int_to_ptr.vmem [resolvable:$true] %s4069_s26 }
 0x697   : > { %s5993_s20 = sld [smem:[#allocation27_spill]]  ;;  %s4040_s13 = scalar_lea.sflag [#allocation5], %s5988_s18 }
 0x698   : > { %s4868_s25 = scalar_lea.vmem %s5877_s26, 128  ;;  %s5040_s27 = smov [#allocation4]  }
 0x699   : > { %p4869_p6 = scmp.ne.s32.totalorder %s5877_s26, %s4868_s25  ;;  %s4872_s14 = sshll.u32 %s5040_s27, 4  ;;  %s4873_s14 = int_to_ptr.vmem [resolvable:$false] %s4872_s14 }
 0x69a   : > { %s4874_s19 = scalar_lea.vmem %s4873_s14, 256  ;;  %p4875_p10 = scmp.lt.s32.totalorder %s5877_s26, %s4873_s14 }
 0x69b   : > { %p4870_p7 = pnand %p4869_p6, %p5162_p3  ;;  %p4876_p11 = scmp.lt.s32.totalorder %s4874_s19, %s4868_s25 }
 0x69c   : > { %v4324_v2 = vld [vmem:[%s5992_s30] ss:$0 sm:$0xff] }
 0x69d   : > { %s5875_s15 = scalar_lea.hbm %s5993_s20, %s4329_s5  ;;  %p4871_p9 = pneg %p4870_p7 }
 0x69e   : > { %p4877_p12 = por %p4876_p11, %p4875_p10 }
 0x6a0   : > { %p4878_p13 = pnand %p4877_p12, %p4871_p9 }
 0x75b   : > { %v4028_v4 = vpop.f32.mrb[34].mxu0 }
 0x75c   : > { %v4029_v28 = vadd.f32 %v4324_v2, %v4028_v4  ;;  %v4606_v17 = vpop.f32.mrb[35].mxu0 }
 0x75e   : > { %v4032_v3 = vmax.f32 %v4029_v28, 0.0 }
 0x760   : > { %v4037_v45 = vadd.f32 %v4035_v46, %v4032_v3 }
 0x762   : > { %4038 = vst.msk [vmem:[%s5204_s16] sm:$0xff] %vm759_vm7, %v4037_v45 }
 0x763   : > { %4881 = shalt.err (!%p4878_p13)
}
 0x764   : > { %s4882_s16 = scalar_lea.hbm %s5875_s15, 128  ;;  %s4886_s21 = scalar_lea.hbm %s5993_s20, 512 }
 0x765   : > { %p4883_p0 = scmp.ne.s32.totalorder %s5875_s15, %s4882_s16  ;;  %p4887_p4 = scmp.lt.u32.totalorder %s5875_s15, %s5993_s20 }
 0x766   : > { %p4888_p5 = scmp.lt.u32.totalorder %s4886_s21, %s4882_s16  ;;  %p4890_p7 = scmp.lt.u32.totalorder %s4882_s16, %s5875_s15 }
 0x767   : > { %p4884_p1 = pnand %p4883_p0, %p5162_p3 }
 0x768   : > { %p4889_p6 = por %p4888_p5, %p4887_p4 }
 0x769   : > { %p4885_p2 = pneg %p4884_p1 }
 0x76a   : > { %p4891_p9 = por %p4890_p7, %p4889_p6 }
 0x76c   : > { %p4892_p10 = pnand %p4891_p9, %p4885_p2 }
 0x76e   : > { %4895 = shalt.err (!%p4892_p10)
}
 0x76f   : > { %4622 = dma.vmem_to_hbm [thread:$0]  (%p5162_p3), %s5877_s26, 128, %s5875_s15, %s4040_s13  }
 0x770 PF: > { %s5994_s6 = sld [smem:[#allocation16_spill]]  ;;  %s5995_s7 = sld [smem:[#allocation10_spill]] }
 0x776   : > { %p4633_p11 = scmp.ge.s32.totalorder %s5994_s6, 2  ;;  %s4099_s28 = sand.u32 1, %s5995_s7  }
 0x777   : > { %s4100_s29 = scalar_lea.sflag [#allocation5], %s4099_s28 }
 0x778   : > { %p4627_p12 = pnand %p4633_p11, %p5171_p8 }
 0x77a   : > { %4929 = dma.done.wait (!%p4627_p12), %s4100_s29, 128  }
 0x77b   : > { %4931 = vsyncadd (!%p4627_p12), %s4100_s29, 4294967168  ;;  %s4121_s25 = scalar_lea.sflag [#allocation7], %s4099_s28 }
 0x77c   : > { %4933 = dma.done.wait (!%p4627_p12), %s4121_s25, 128  }
 0x77d   : > { %4935 = vsyncadd (!%p4627_p12), %s4121_s25, 4294967168  ;;  %s30_s15 = sadd.s32 1, %s5994_s6   ;;  %s5997_s25 = sld [smem:[#allocation11_spill]] }
 0x77e   : > { %p27_p13 = scmp.ge.s32.totalorder %s30_s15, 6   ;;  %s5998_s26 = sld [smem:[#allocation12_spill]] }
 0x77f   : > { %s5999_s27 = sld [smem:[#allocation21_spill]]  ;;  %s6000_s28 = sld [smem:[#allocation14_spill]] }
 0x780   : > { %s6001_s29 = sld [smem:[#allocation15_spill]]  ;;  %s6002_s30 = sld [smem:[#allocation17_spill]] }
 0x781   : > { %s6003_s14 = sld [smem:[#allocation19_spill]]  ;;  %29 = sbr.rel (!%p27_p13) target bundleno = 14 (0xe), region = 138 }
 0x788   :  { %4126 = vsyncpa [#allocation5], 1 }
 0x789   :  { %4128 = vsyncpa [#allocation5 + $0x1], 1 }
 0x78a   :  { %4129 = vsyncpa [#allocation7], 1 }
 0x78b   :  { %4131 = vsyncpa [#allocation7 + $0x1], 1 }

</bundles_post_ra>
